<compile_context>
chip_gen: v6e
topology: v6e:2x2x1
jax: 0.10.0
libtpu: 0.0.40
codegen_flags: <defaults>
</compile_context>

<pallas_src>
import jax
import jax.numpy as jnp
from jax import lax
from jax.experimental import pallas as pl
from jax.experimental.pallas import tpu as pltpu

ITERS = 3        # module iter_=3.0 -> 3 skeletonization iterations
SMOOTH = 1.0

_SUBLANE = 8
_LANE = 128


def _round_up(x, m):
    return (x + m - 1) // m * m


def _make_cldice_kernel(H, W, Hp, Wp):
    """Build the per-(batch, foreground-channel) kernel for static sizes.

    The wrapper zero-pads each (H, W) image to an aligned (Hp, Wp) tile, so
    there is no in-kernel pad/concat copy.  Inputs are soft segmentation
    probabilities (>= 0); with zero padding the erosion chain stays exactly 0
    in the pad region and the skeleton is exactly 0 there, so no validity mask
    is needed and (where a pad row / column exists) the dilate edge selects
    are provably no-ops and are not emitted.
    """
    # Keep dilate edge selects only when there is no pad row/column to absorb
    # the roll wrap-around in that direction.
    need_v_sel = (Hp == H)
    need_h_sel = (Wp == W)

    def kernel(yt_ref, yp_ref, out_ref):
        # True-image-edge masks inside the padded tile.  Two iotas + four
        # compares per step -- negligible next to the ~88 rolls below.
        row_i = lax.broadcasted_iota(jnp.int32, (Hp, Wp), 0)
        col_i = lax.broadcasted_iota(jnp.int32, (Hp, Wp), 1)
        m_top = row_i == 0
        m_bot = row_i == (H - 1)
        m_left = col_i == 0
        m_right = col_i == (W - 1)

        def soft_erode(x):
            # min over the 5-pixel cross; +inf padding == fill edges with x.
            up = jnp.where(m_top, x, pltpu.roll(x, shift=1, axis=0))
            dn = jnp.where(m_bot, x, pltpu.roll(x, shift=Hp - 1, axis=0))
            lf = jnp.where(m_left, x, pltpu.roll(x, shift=1, axis=1))
            rt = jnp.where(m_right, x, pltpu.roll(x, shift=Wp - 1, axis=1))
            return jnp.minimum(
                jnp.minimum(jnp.minimum(up, dn), jnp.minimum(lf, rt)), x)

        def soft_dilate(x):
            # Separable 3x3 max.  A zero pad row/col makes the wrapped value
            # <= x for >= 0 inputs, so the edge select is skipped there.
            up = pltpu.roll(x, shift=1, axis=0)
            dn = pltpu.roll(x, shift=Hp - 1, axis=0)
            if need_v_sel:
                up = jnp.where(m_top, x, up)
                dn = jnp.where(m_bot, x, dn)
            v = jnp.maximum(jnp.maximum(up, dn), x)
            lf = pltpu.roll(v, shift=1, axis=1)
            rt = pltpu.roll(v, shift=Wp - 1, axis=1)
            if need_h_sel:
                lf = jnp.where(m_left, v, lf)
                rt = jnp.where(m_right, v, rt)
            return jnp.maximum(jnp.maximum(lf, rt), v)

        def soft_open(x):
            return soft_dilate(soft_erode(x))

        def soft_skel(img):
            img1 = soft_open(img)
            skel = jnp.maximum(img - img1, 0.0)
            for _ in range(ITERS):
                img = soft_erode(img)
                img1 = soft_open(img)
                delta = jnp.maximum(img - img1, 0.0)
                skel = skel + jnp.maximum(delta - skel * delta, 0.0)
            return skel

        yt = yt_ref[0, 0]          # (Hp, Wp), zero in the pad region
        yp = yp_ref[0, 0]

        skel_pred = soft_skel(yp)
        skel_true = soft_skel(yt)

        # Skeletons (and yt/yp) are exactly 0 in the pad region, so plain
        # full-tile sums are exact -- no validity mask needed.
        s_pt = jnp.sum(skel_pred * yt)    # sum(skel_pred * y_true)
        s_p = jnp.sum(skel_pred)          # sum(skel_pred)
        s_tp = jnp.sum(skel_true * yp)    # sum(skel_true * y_pred)
        s_t = jnp.sum(skel_true)          # sum(skel_true)

        # One (1, 4) store per grid step (single output DMA instead of four).
        lane = lax.broadcasted_iota(jnp.int32, (1, 4), 1)
        out_ref[0, 0] = (jnp.where(lane == 0, s_pt, 0.0)
                         + jnp.where(lane == 1, s_p, 0.0)
                         + jnp.where(lane == 2, s_tp, 0.0)
                         + jnp.where(lane == 3, s_t, 0.0))

    return kernel


def soft_cldice(y_true, y_pred, smooth=SMOOTH):
    """clDice loss forward pass (inputs NCHW; channel 0 = background)."""
    assert y_true.shape == y_pred.shape
    B, C, H, W = y_true.shape
    if C <= 1:
        # No foreground channels: both sums are empty -> tprec = tsens = 1.
        return jnp.float32(0.0)

    Hp = _round_up(H, _SUBLANE)
    Wp = _round_up(W, _LANE)
    CF = C - 1

    # Single XLA zero-pad in HBM (background channel dropped in the same op);
    # all kernel blocks are lane/sublane aligned with no in-kernel copies.
    pad = ((0, 0), (0, 0), (0, Hp - H), (0, Wp - W))
    yt = jnp.pad(y_true.astype(jnp.float32)[:, 1:], pad)
    yp = jnp.pad(y_pred.astype(jnp.float32)[:, 1:], pad)

    img_spec = pl.BlockSpec((1, 1, Hp, Wp), lambda b, c: (b, c, 0, 0))
    out_spec = pl.BlockSpec((1, 1, 1, 4), lambda b, c: (b, c, 0, 0))

    partials = pl.pallas_call(
        _make_cldice_kernel(H, W, Hp, Wp),
        out_shape=jax.ShapeDtypeStruct((B, CF, 1, 4), jnp.float32),
        grid_spec=pltpu.PrefetchScalarGridSpec(
            num_scalar_prefetch=0,
            grid=(B, CF),
            in_specs=[img_spec, img_spec],
            out_specs=out_spec,
        ),
        compiler_params=pltpu.CompilerParams(
            # Every grid step writes its own output block -> both axes are
            # parallel (shards across both v7x TensorCores at small batch).
            dimension_semantics=("parallel", "parallel"),
            # Per-step working set is ~2 inputs x 2 buffers x one Hp*Wp*4B
            # tile plus a handful of live tiles; 48 MiB keeps double-buffering
            # for ~1k^2 images while leaving headroom on v7x's 64 MiB VMEM.
            vmem_limit_bytes=48 * 1024 * 1024,
        ),
    )(yt, yp)

    s_pt, s_p, s_tp, s_t = jnp.sum(partials, axis=(0, 1, 2))
    tprec = (s_pt + smooth) / (s_p + smooth)
    tsens = (s_tp + smooth) / (s_t + smooth)
    return 1.0 - 2.0 * (tprec * tsens) / (tprec + tsens)


# ----------------------------- pure-JAX reference ----------------------------
def _ref_soft_erode(img):
    p1 = -lax.reduce_window(-img, -jnp.inf, lax.max, (1, 1, 3, 1), (1, 1, 1, 1),
                            ((0, 0), (0, 0), (1, 1), (0, 0)))
    p2 = -lax.reduce_window(-img, -jnp.inf, lax.max, (1, 1, 1, 3), (1, 1, 1, 1),
                            ((0, 0), (0, 0), (0, 0), (1, 1)))
    return jnp.minimum(p1, p2)


def _ref_soft_dilate(img):
    return lax.reduce_window(img, -jnp.inf, lax.max, (1, 1, 3, 3), (1, 1, 1, 1),
                             ((0, 0), (0, 0), (1, 1), (1, 1)))


def _ref_soft_skel(img, iters):
    img1 = _ref_soft_dilate(_ref_soft_erode(img))
    skel = jnp.maximum(img - img1, 0.0)
    for _ in range(iters):
        img = _ref_soft_erode(img)
        img1 = _ref_soft_dilate(_ref_soft_erode(img))
        delta = jnp.maximum(img - img1, 0.0)
        skel = skel + jnp.maximum(delta - skel * delta, 0.0)
    return skel


def _ref_cldice(y_true, y_pred, smooth=SMOOTH):
    skel_pred = _ref_soft_skel(y_pred, ITERS)
    skel_true = _ref_soft_skel(y_true, ITERS)
    tprec = (jnp.sum((skel_pred * y_true)[:, 1:]) + smooth) / (
        jnp.sum(skel_pred[:, 1:]) + smooth)
    tsens = (jnp.sum((skel_true * y_pred)[:, 1:]) + smooth) / (
        jnp.sum(skel_true[:, 1:]) + smooth)
    return 1.0 - 2.0 * (tprec * tsens) / (tprec + tsens)


if __name__ == "__main__":
    key = jax.random.PRNGKey(0)
    k1, k2 = jax.random.split(key)
    B, C, H, W = 2, 4, 16, 16
    y_true = jax.random.uniform(k1, (B, C, H, W), dtype=jnp.float32)
    y_pred = jax.random.uniform(k2, (B, C, H, W), dtype=jnp.float32)

    out = jax.block_until_ready(soft_cldice(y_true, y_pred))
    ref = jax.block_until_ready(_ref_cldice(y_true, y_pred))
    assert jnp.allclose(out, ref, atol=1e-5, rtol=1e-4), (out, ref)

    print("KERNEL_OK")
</pallas_src>

<mosaic_0001>
module attributes {stable_mosaic.version = 11 : i64} {
  func.func @kernel(%arg0: i32, %arg1: i32, %arg2: memref<1x1x16x128xf32, #tpu.memory_space<vmem>>, %arg3: memref<1x1x16x128xf32, #tpu.memory_space<vmem>>, %arg4: memref<1x1x1x4xf32, #tpu.memory_space<vmem>>) attributes {dimension_semantics = [#tpu.dimension_semantics<parallel>, #tpu.dimension_semantics<parallel>], iteration_bounds = array<i64: 2, 3>, scalar_prefetch = 0 : i64, scratch_operands = 0 : i64, tpu.core_type = #tpu.core_type<tc>, window_params = [{transform_indices = @transform_0, window_bounds = array<i64: 1, 1, 16, 128>}, {transform_indices = @transform_1, window_bounds = array<i64: 1, 1, 16, 128>}, {transform_indices = @transform_2, window_bounds = array<i64: 1, 1, 1, 4>}]} {
    %0 = tpu.iota {dimensions = array<i32: 0>} : vector<16x128xi32>
    %1 = tpu.iota {dimensions = array<i32: 1>} : vector<16x128xi32>
    %c0_i32 = arith.constant 0 : i32
    %2 = vector.broadcast %c0_i32 : i32 to vector<16x128xi32>
    %3 = arith.cmpi eq, %0, %2 : vector<16x128xi32>
    %c15_i32 = arith.constant 15 : i32
    %4 = vector.broadcast %c15_i32 : i32 to vector<16x128xi32>
    %5 = arith.cmpi eq, %0, %4 : vector<16x128xi32>
    %c0_i32_0 = arith.constant 0 : i32
    %6 = vector.broadcast %c0_i32_0 : i32 to vector<16x128xi32>
    %7 = arith.cmpi eq, %1, %6 : vector<16x128xi32>
    %c15_i32_1 = arith.constant 15 : i32
    %8 = vector.broadcast %c15_i32_1 : i32 to vector<16x128xi32>
    %9 = arith.cmpi eq, %1, %8 : vector<16x128xi32>
    %c0 = arith.constant 0 : index
    %c0_2 = arith.constant 0 : index
    %c0_3 = arith.constant 0 : index
    %c0_4 = arith.constant 0 : index
    %10 = vector.load %arg2[%c0, %c0_2, %c0_3, %c0_4] : memref<1x1x16x128xf32, #tpu.memory_space<vmem>>, vector<1x1x16x128xf32>
    %11 = vector.shape_cast %10 : vector<1x1x16x128xf32> to vector<16x128xf32>
    %c0_5 = arith.constant 0 : index
    %c0_6 = arith.constant 0 : index
    %c0_7 = arith.constant 0 : index
    %c0_8 = arith.constant 0 : index
    %12 = vector.load %arg3[%c0_5, %c0_6, %c0_7, %c0_8] : memref<1x1x16x128xf32, #tpu.memory_space<vmem>>, vector<1x1x16x128xf32>
    %13 = vector.shape_cast %12 : vector<1x1x16x128xf32> to vector<16x128xf32>
    %c1_i32 = arith.constant 1 : i32
    %14 = tpu.dynamic_rotate %13 by %c1_i32 dim 0 : vector<16x128xf32>, i32 -> vector<16x128xf32>
    %15 = arith.select %3, %13, %14 : vector<16x128xi1>, vector<16x128xf32>
    %c15_i32_9 = arith.constant 15 : i32
    %16 = tpu.dynamic_rotate %13 by %c15_i32_9 dim 0 : vector<16x128xf32>, i32 -> vector<16x128xf32>
    %17 = arith.select %5, %13, %16 : vector<16x128xi1>, vector<16x128xf32>
    %c1_i32_10 = arith.constant 1 : i32
    %18 = tpu.dynamic_rotate %13 by %c1_i32_10 dim 1 : vector<16x128xf32>, i32 -> vector<16x128xf32>
    %19 = arith.select %7, %13, %18 : vector<16x128xi1>, vector<16x128xf32>
    %c127_i32 = arith.constant 127 : i32
    %20 = tpu.dynamic_rotate %13 by %c127_i32 dim 1 : vector<16x128xf32>, i32 -> vector<16x128xf32>
    %21 = arith.select %9, %13, %20 : vector<16x128xi1>, vector<16x128xf32>
    %22 = arith.minimumf %15, %17 : vector<16x128xf32>
    %23 = arith.minimumf %19, %21 : vector<16x128xf32>
    %24 = arith.minimumf %22, %23 : vector<16x128xf32>
    %25 = arith.minimumf %24, %13 : vector<16x128xf32>
    %c1_i32_11 = arith.constant 1 : i32
    %26 = tpu.dynamic_rotate %25 by %c1_i32_11 dim 0 : vector<16x128xf32>, i32 -> vector<16x128xf32>
    %c15_i32_12 = arith.constant 15 : i32
    %27 = tpu.dynamic_rotate %25 by %c15_i32_12 dim 0 : vector<16x128xf32>, i32 -> vector<16x128xf32>
    %28 = arith.select %3, %25, %26 : vector<16x128xi1>, vector<16x128xf32>
    %29 = arith.select %5, %25, %27 : vector<16x128xi1>, vector<16x128xf32>
    %30 = arith.maximumf %28, %29 : vector<16x128xf32>
    %31 = arith.maximumf %30, %25 : vector<16x128xf32>
    %c1_i32_13 = arith.constant 1 : i32
    %32 = tpu.dynamic_rotate %31 by %c1_i32_13 dim 1 : vector<16x128xf32>, i32 -> vector<16x128xf32>
    %c127_i32_14 = arith.constant 127 : i32
    %33 = tpu.dynamic_rotate %31 by %c127_i32_14 dim 1 : vector<16x128xf32>, i32 -> vector<16x128xf32>
    %34 = arith.maximumf %32, %33 : vector<16x128xf32>
    %35 = arith.maximumf %34, %31 : vector<16x128xf32>
    %36 = arith.subf %13, %35 : vector<16x128xf32>
    %cst = arith.constant 0.000000e+00 : f32
    %37 = vector.broadcast %cst : f32 to vector<16x128xf32>
    %38 = arith.maximumf %36, %37 : vector<16x128xf32>
    %c1_i32_15 = arith.constant 1 : i32
    %39 = tpu.dynamic_rotate %13 by %c1_i32_15 dim 0 : vector<16x128xf32>, i32 -> vector<16x128xf32>
    %40 = arith.select %3, %13, %39 : vector<16x128xi1>, vector<16x128xf32>
    %c15_i32_16 = arith.constant 15 : i32
    %41 = tpu.dynamic_rotate %13 by %c15_i32_16 dim 0 : vector<16x128xf32>, i32 -> vector<16x128xf32>
    %42 = arith.select %5, %13, %41 : vector<16x128xi1>, vector<16x128xf32>
    %c1_i32_17 = arith.constant 1 : i32
    %43 = tpu.dynamic_rotate %13 by %c1_i32_17 dim 1 : vector<16x128xf32>, i32 -> vector<16x128xf32>
    %44 = arith.select %7, %13, %43 : vector<16x128xi1>, vector<16x128xf32>
    %c127_i32_18 = arith.constant 127 : i32
    %45 = tpu.dynamic_rotate %13 by %c127_i32_18 dim 1 : vector<16x128xf32>, i32 -> vector<16x128xf32>
    %46 = arith.select %9, %13, %45 : vector<16x128xi1>, vector<16x128xf32>
    %47 = arith.minimumf %40, %42 : vector<16x128xf32>
    %48 = arith.minimumf %44, %46 : vector<16x128xf32>
    %49 = arith.minimumf %47, %48 : vector<16x128xf32>
    %50 = arith.minimumf %49, %13 : vector<16x128xf32>
    %c1_i32_19 = arith.constant 1 : i32
    %51 = tpu.dynamic_rotate %50 by %c1_i32_19 dim 0 : vector<16x128xf32>, i32 -> vector<16x128xf32>
    %52 = arith.select %3, %50, %51 : vector<16x128xi1>, vector<16x128xf32>
    %c15_i32_20 = arith.constant 15 : i32
    %53 = tpu.dynamic_rotate %50 by %c15_i32_20 dim 0 : vector<16x128xf32>, i32 -> vector<16x128xf32>
    %54 = arith.select %5, %50, %53 : vector<16x128xi1>, vector<16x128xf32>
    %c1_i32_21 = arith.constant 1 : i32
    %55 = tpu.dynamic_rotate %50 by %c1_i32_21 dim 1 : vector<16x128xf32>, i32 -> vector<16x128xf32>
    %56 = arith.select %7, %50, %55 : vector<16x128xi1>, vector<16x128xf32>
    %c127_i32_22 = arith.constant 127 : i32
    %57 = tpu.dynamic_rotate %50 by %c127_i32_22 dim 1 : vector<16x128xf32>, i32 -> vector<16x128xf32>
    %58 = arith.select %9, %50, %57 : vector<16x128xi1>, vector<16x128xf32>
    %59 = arith.minimumf %52, %54 : vector<16x128xf32>
    %60 = arith.minimumf %56, %58 : vector<16x128xf32>
    %61 = arith.minimumf %59, %60 : vector<16x128xf32>
    %62 = arith.minimumf %61, %50 : vector<16x128xf32>
    %c1_i32_23 = arith.constant 1 : i32
    %63 = tpu.dynamic_rotate %62 by %c1_i32_23 dim 0 : vector<16x128xf32>, i32 -> vector<16x128xf32>
    %c15_i32_24 = arith.constant 15 : i32
    %64 = tpu.dynamic_rotate %62 by %c15_i32_24 dim 0 : vector<16x128xf32>, i32 -> vector<16x128xf32>
    %65 = arith.select %3, %62, %63 : vector<16x128xi1>, vector<16x128xf32>
    %66 = arith.select %5, %62, %64 : vector<16x128xi1>, vector<16x128xf32>
    %67 = arith.maximumf %65, %66 : vector<16x128xf32>
    %68 = arith.maximumf %67, %62 : vector<16x128xf32>
    %c1_i32_25 = arith.constant 1 : i32
    %69 = tpu.dynamic_rotate %68 by %c1_i32_25 dim 1 : vector<16x128xf32>, i32 -> vector<16x128xf32>
    %c127_i32_26 = arith.constant 127 : i32
    %70 = tpu.dynamic_rotate %68 by %c127_i32_26 dim 1 : vector<16x128xf32>, i32 -> vector<16x128xf32>
    %71 = arith.maximumf %69, %70 : vector<16x128xf32>
    %72 = arith.maximumf %71, %68 : vector<16x128xf32>
    %73 = arith.subf %50, %72 : vector<16x128xf32>
    %cst_27 = arith.constant 0.000000e+00 : f32
    %74 = vector.broadcast %cst_27 : f32 to vector<16x128xf32>
    %75 = arith.maximumf %73, %74 : vector<16x128xf32>
    %76 = arith.mulf %38, %75 : vector<16x128xf32>
    %77 = arith.subf %75, %76 : vector<16x128xf32>
    %cst_28 = arith.constant 0.000000e+00 : f32
    %78 = vector.broadcast %cst_28 : f32 to vector<16x128xf32>
    %79 = arith.maximumf %77, %78 : vector<16x128xf32>
    %80 = arith.addf %38, %79 : vector<16x128xf32>
    %c1_i32_29 = arith.constant 1 : i32
    %81 = tpu.dynamic_rotate %50 by %c1_i32_29 dim 0 : vector<16x128xf32>, i32 -> vector<16x128xf32>
    %82 = arith.select %3, %50, %81 : vector<16x128xi1>, vector<16x128xf32>
    %c15_i32_30 = arith.constant 15 : i32
    %83 = tpu.dynamic_rotate %50 by %c15_i32_30 dim 0 : vector<16x128xf32>, i32 -> vector<16x128xf32>
    %84 = arith.select %5, %50, %83 : vector<16x128xi1>, vector<16x128xf32>
    %c1_i32_31 = arith.constant 1 : i32
    %85 = tpu.dynamic_rotate %50 by %c1_i32_31 dim 1 : vector<16x128xf32>, i32 -> vector<16x128xf32>
    %86 = arith.select %7, %50, %85 : vector<16x128xi1>, vector<16x128xf32>
    %c127_i32_32 = arith.constant 127 : i32
    %87 = tpu.dynamic_rotate %50 by %c127_i32_32 dim 1 : vector<16x128xf32>, i32 -> vector<16x128xf32>
    %88 = arith.select %9, %50, %87 : vector<16x128xi1>, vector<16x128xf32>
    %89 = arith.minimumf %82, %84 : vector<16x128xf32>
    %90 = arith.minimumf %86, %88 : vector<16x128xf32>
    %91 = arith.minimumf %89, %90 : vector<16x128xf32>
    %92 = arith.minimumf %91, %50 : vector<16x128xf32>
    %c1_i32_33 = arith.constant 1 : i32
    %93 = tpu.dynamic_rotate %92 by %c1_i32_33 dim 0 : vector<16x128xf32>, i32 -> vector<16x128xf32>
    %94 = arith.select %3, %92, %93 : vector<16x128xi1>, vector<16x128xf32>
    %c15_i32_34 = arith.constant 15 : i32
    %95 = tpu.dynamic_rotate %92 by %c15_i32_34 dim 0 : vector<16x128xf32>, i32 -> vector<16x128xf32>
    %96 = arith.select %5, %92, %95 : vector<16x128xi1>, vector<16x128xf32>
    %c1_i32_35 = arith.constant 1 : i32
    %97 = tpu.dynamic_rotate %92 by %c1_i32_35 dim 1 : vector<16x128xf32>, i32 -> vector<16x128xf32>
    %98 = arith.select %7, %92, %97 : vector<16x128xi1>, vector<16x128xf32>
    %c127_i32_36 = arith.constant 127 : i32
    %99 = tpu.dynamic_rotate %92 by %c127_i32_36 dim 1 : vector<16x128xf32>, i32 -> vector<16x128xf32>
    %100 = arith.select %9, %92, %99 : vector<16x128xi1>, vector<16x128xf32>
    %101 = arith.minimumf %94, %96 : vector<16x128xf32>
    %102 = arith.minimumf %98, %100 : vector<16x128xf32>
    %103 = arith.minimumf %101, %102 : vector<16x128xf32>
    %104 = arith.minimumf %103, %92 : vector<16x128xf32>
    %c1_i32_37 = arith.constant 1 : i32
    %105 = tpu.dynamic_rotate %104 by %c1_i32_37 dim 0 : vector<16x128xf32>, i32 -> vector<16x128xf32>
    %c15_i32_38 = arith.constant 15 : i32
    %106 = tpu.dynamic_rotate %104 by %c15_i32_38 dim 0 : vector<16x128xf32>, i32 -> vector<16x128xf32>
    %107 = arith.select %3, %104, %105 : vector<16x128xi1>, vector<16x128xf32>
    %108 = arith.select %5, %104, %106 : vector<16x128xi1>, vector<16x128xf32>
    %109 = arith.maximumf %107, %108 : vector<16x128xf32>
    %110 = arith.maximumf %109, %104 : vector<16x128xf32>
    %c1_i32_39 = arith.constant 1 : i32
    %111 = tpu.dynamic_rotate %110 by %c1_i32_39 dim 1 : vector<16x128xf32>, i32 -> vector<16x128xf32>
    %c127_i32_40 = arith.constant 127 : i32
    %112 = tpu.dynamic_rotate %110 by %c127_i32_40 dim 1 : vector<16x128xf32>, i32 -> vector<16x128xf32>
    %113 = arith.maximumf %111, %112 : vector<16x128xf32>
    %114 = arith.maximumf %113, %110 : vector<16x128xf32>
    %115 = arith.subf %92, %114 : vector<16x128xf32>
    %cst_41 = arith.constant 0.000000e+00 : f32
    %116 = vector.broadcast %cst_41 : f32 to vector<16x128xf32>
    %117 = arith.maximumf %115, %116 : vector<16x128xf32>
    %118 = arith.mulf %80, %117 : vector<16x128xf32>
    %119 = arith.subf %117, %118 : vector<16x128xf32>
    %cst_42 = arith.constant 0.000000e+00 : f32
    %120 = vector.broadcast %cst_42 : f32 to vector<16x128xf32>
    %121 = arith.maximumf %119, %120 : vector<16x128xf32>
    %122 = arith.addf %80, %121 : vector<16x128xf32>
    %c1_i32_43 = arith.constant 1 : i32
    %123 = tpu.dynamic_rotate %92 by %c1_i32_43 dim 0 : vector<16x128xf32>, i32 -> vector<16x128xf32>
    %124 = arith.select %3, %92, %123 : vector<16x128xi1>, vector<16x128xf32>
    %c15_i32_44 = arith.constant 15 : i32
    %125 = tpu.dynamic_rotate %92 by %c15_i32_44 dim 0 : vector<16x128xf32>, i32 -> vector<16x128xf32>
    %126 = arith.select %5, %92, %125 : vector<16x128xi1>, vector<16x128xf32>
    %c1_i32_45 = arith.constant 1 : i32
    %127 = tpu.dynamic_rotate %92 by %c1_i32_45 dim 1 : vector<16x128xf32>, i32 -> vector<16x128xf32>
    %128 = arith.select %7, %92, %127 : vector<16x128xi1>, vector<16x128xf32>
    %c127_i32_46 = arith.constant 127 : i32
    %129 = tpu.dynamic_rotate %92 by %c127_i32_46 dim 1 : vector<16x128xf32>, i32 -> vector<16x128xf32>
    %130 = arith.select %9, %92, %129 : vector<16x128xi1>, vector<16x128xf32>
    %131 = arith.minimumf %124, %126 : vector<16x128xf32>
    %132 = arith.minimumf %128, %130 : vector<16x128xf32>
    %133 = arith.minimumf %131, %132 : vector<16x128xf32>
    %134 = arith.minimumf %133, %92 : vector<16x128xf32>
    %c1_i32_47 = arith.constant 1 : i32
    %135 = tpu.dynamic_rotate %134 by %c1_i32_47 dim 0 : vector<16x128xf32>, i32 -> vector<16x128xf32>
    %136 = arith.select %3, %134, %135 : vector<16x128xi1>, vector<16x128xf32>
    %c15_i32_48 = arith.constant 15 : i32
    %137 = tpu.dynamic_rotate %134 by %c15_i32_48 dim 0 : vector<16x128xf32>, i32 -> vector<16x128xf32>
    %138 = arith.select %5, %134, %137 : vector<16x128xi1>, vector<16x128xf32>
    %c1_i32_49 = arith.constant 1 : i32
    %139 = tpu.dynamic_rotate %134 by %c1_i32_49 dim 1 : vector<16x128xf32>, i32 -> vector<16x128xf32>
    %140 = arith.select %7, %134, %139 : vector<16x128xi1>, vector<16x128xf32>
    %c127_i32_50 = arith.constant 127 : i32
    %141 = tpu.dynamic_rotate %134 by %c127_i32_50 dim 1 : vector<16x128xf32>, i32 -> vector<16x128xf32>
    %142 = arith.select %9, %134, %141 : vector<16x128xi1>, vector<16x128xf32>
    %143 = arith.minimumf %136, %138 : vector<16x128xf32>
    %144 = arith.minimumf %140, %142 : vector<16x128xf32>
    %145 = arith.minimumf %143, %144 : vector<16x128xf32>
    %146 = arith.minimumf %145, %134 : vector<16x128xf32>
    %c1_i32_51 = arith.constant 1 : i32
    %147 = tpu.dynamic_rotate %146 by %c1_i32_51 dim 0 : vector<16x128xf32>, i32 -> vector<16x128xf32>
    %c15_i32_52 = arith.constant 15 : i32
    %148 = tpu.dynamic_rotate %146 by %c15_i32_52 dim 0 : vector<16x128xf32>, i32 -> vector<16x128xf32>
    %149 = arith.select %3, %146, %147 : vector<16x128xi1>, vector<16x128xf32>
    %150 = arith.select %5, %146, %148 : vector<16x128xi1>, vector<16x128xf32>
    %151 = arith.maximumf %149, %150 : vector<16x128xf32>
    %152 = arith.maximumf %151, %146 : vector<16x128xf32>
    %c1_i32_53 = arith.constant 1 : i32
    %153 = tpu.dynamic_rotate %152 by %c1_i32_53 dim 1 : vector<16x128xf32>, i32 -> vector<16x128xf32>
    %c127_i32_54 = arith.constant 127 : i32
    %154 = tpu.dynamic_rotate %152 by %c127_i32_54 dim 1 : vector<16x128xf32>, i32 -> vector<16x128xf32>
    %155 = arith.maximumf %153, %154 : vector<16x128xf32>
    %156 = arith.maximumf %155, %152 : vector<16x128xf32>
    %157 = arith.subf %134, %156 : vector<16x128xf32>
    %cst_55 = arith.constant 0.000000e+00 : f32
    %158 = vector.broadcast %cst_55 : f32 to vector<16x128xf32>
    %159 = arith.maximumf %157, %158 : vector<16x128xf32>
    %160 = arith.mulf %122, %159 : vector<16x128xf32>
    %161 = arith.subf %159, %160 : vector<16x128xf32>
    %cst_56 = arith.constant 0.000000e+00 : f32
    %162 = vector.broadcast %cst_56 : f32 to vector<16x128xf32>
    %163 = arith.maximumf %161, %162 : vector<16x128xf32>
    %164 = arith.addf %122, %163 : vector<16x128xf32>
    %c1_i32_57 = arith.constant 1 : i32
    %165 = tpu.dynamic_rotate %11 by %c1_i32_57 dim 0 : vector<16x128xf32>, i32 -> vector<16x128xf32>
    %166 = arith.select %3, %11, %165 : vector<16x128xi1>, vector<16x128xf32>
    %c15_i32_58 = arith.constant 15 : i32
    %167 = tpu.dynamic_rotate %11 by %c15_i32_58 dim 0 : vector<16x128xf32>, i32 -> vector<16x128xf32>
    %168 = arith.select %5, %11, %167 : vector<16x128xi1>, vector<16x128xf32>
    %c1_i32_59 = arith.constant 1 : i32
    %169 = tpu.dynamic_rotate %11 by %c1_i32_59 dim 1 : vector<16x128xf32>, i32 -> vector<16x128xf32>
    %170 = arith.select %7, %11, %169 : vector<16x128xi1>, vector<16x128xf32>
    %c127_i32_60 = arith.constant 127 : i32
    %171 = tpu.dynamic_rotate %11 by %c127_i32_60 dim 1 : vector<16x128xf32>, i32 -> vector<16x128xf32>
    %172 = arith.select %9, %11, %171 : vector<16x128xi1>, vector<16x128xf32>
    %173 = arith.minimumf %166, %168 : vector<16x128xf32>
    %174 = arith.minimumf %170, %172 : vector<16x128xf32>
    %175 = arith.minimumf %173, %174 : vector<16x128xf32>
    %176 = arith.minimumf %175, %11 : vector<16x128xf32>
    %c1_i32_61 = arith.constant 1 : i32
    %177 = tpu.dynamic_rotate %176 by %c1_i32_61 dim 0 : vector<16x128xf32>, i32 -> vector<16x128xf32>
    %c15_i32_62 = arith.constant 15 : i32
    %178 = tpu.dynamic_rotate %176 by %c15_i32_62 dim 0 : vector<16x128xf32>, i32 -> vector<16x128xf32>
    %179 = arith.select %3, %176, %177 : vector<16x128xi1>, vector<16x128xf32>
    %180 = arith.select %5, %176, %178 : vector<16x128xi1>, vector<16x128xf32>
    %181 = arith.maximumf %179, %180 : vector<16x128xf32>
    %182 = arith.maximumf %181, %176 : vector<16x128xf32>
    %c1_i32_63 = arith.constant 1 : i32
    %183 = tpu.dynamic_rotate %182 by %c1_i32_63 dim 1 : vector<16x128xf32>, i32 -> vector<16x128xf32>
    %c127_i32_64 = arith.constant 127 : i32
    %184 = tpu.dynamic_rotate %182 by %c127_i32_64 dim 1 : vector<16x128xf32>, i32 -> vector<16x128xf32>
    %185 = arith.maximumf %183, %184 : vector<16x128xf32>
    %186 = arith.maximumf %185, %182 : vector<16x128xf32>
    %187 = arith.subf %11, %186 : vector<16x128xf32>
    %cst_65 = arith.constant 0.000000e+00 : f32
    %188 = vector.broadcast %cst_65 : f32 to vector<16x128xf32>
    %189 = arith.maximumf %187, %188 : vector<16x128xf32>
    %c1_i32_66 = arith.constant 1 : i32
    %190 = tpu.dynamic_rotate %11 by %c1_i32_66 dim 0 : vector<16x128xf32>, i32 -> vector<16x128xf32>
    %191 = arith.select %3, %11, %190 : vector<16x128xi1>, vector<16x128xf32>
    %c15_i32_67 = arith.constant 15 : i32
    %192 = tpu.dynamic_rotate %11 by %c15_i32_67 dim 0 : vector<16x128xf32>, i32 -> vector<16x128xf32>
    %193 = arith.select %5, %11, %192 : vector<16x128xi1>, vector<16x128xf32>
    %c1_i32_68 = arith.constant 1 : i32
    %194 = tpu.dynamic_rotate %11 by %c1_i32_68 dim 1 : vector<16x128xf32>, i32 -> vector<16x128xf32>
    %195 = arith.select %7, %11, %194 : vector<16x128xi1>, vector<16x128xf32>
    %c127_i32_69 = arith.constant 127 : i32
    %196 = tpu.dynamic_rotate %11 by %c127_i32_69 dim 1 : vector<16x128xf32>, i32 -> vector<16x128xf32>
    %197 = arith.select %9, %11, %196 : vector<16x128xi1>, vector<16x128xf32>
    %198 = arith.minimumf %191, %193 : vector<16x128xf32>
    %199 = arith.minimumf %195, %197 : vector<16x128xf32>
    %200 = arith.minimumf %198, %199 : vector<16x128xf32>
    %201 = arith.minimumf %200, %11 : vector<16x128xf32>
    %c1_i32_70 = arith.constant 1 : i32
    %202 = tpu.dynamic_rotate %201 by %c1_i32_70 dim 0 : vector<16x128xf32>, i32 -> vector<16x128xf32>
    %203 = arith.select %3, %201, %202 : vector<16x128xi1>, vector<16x128xf32>
    %c15_i32_71 = arith.constant 15 : i32
    %204 = tpu.dynamic_rotate %201 by %c15_i32_71 dim 0 : vector<16x128xf32>, i32 -> vector<16x128xf32>
    %205 = arith.select %5, %201, %204 : vector<16x128xi1>, vector<16x128xf32>
    %c1_i32_72 = arith.constant 1 : i32
    %206 = tpu.dynamic_rotate %201 by %c1_i32_72 dim 1 : vector<16x128xf32>, i32 -> vector<16x128xf32>
    %207 = arith.select %7, %201, %206 : vector<16x128xi1>, vector<16x128xf32>
    %c127_i32_73 = arith.constant 127 : i32
    %208 = tpu.dynamic_rotate %201 by %c127_i32_73 dim 1 : vector<16x128xf32>, i32 -> vector<16x128xf32>
    %209 = arith.select %9, %201, %208 : vector<16x128xi1>, vector<16x128xf32>
    %210 = arith.minimumf %203, %205 : vector<16x128xf32>
    %211 = arith.minimumf %207, %209 : vector<16x128xf32>
    %212 = arith.minimumf %210, %211 : vector<16x128xf32>
    %213 = arith.minimumf %212, %201 : vector<16x128xf32>
    %c1_i32_74 = arith.constant 1 : i32
    %214 = tpu.dynamic_rotate %213 by %c1_i32_74 dim 0 : vector<16x128xf32>, i32 -> vector<16x128xf32>
    %c15_i32_75 = arith.constant 15 : i32
    %215 = tpu.dynamic_rotate %213 by %c15_i32_75 dim 0 : vector<16x128xf32>, i32 -> vector<16x128xf32>
    %216 = arith.select %3, %213, %214 : vector<16x128xi1>, vector<16x128xf32>
    %217 = arith.select %5, %213, %215 : vector<16x128xi1>, vector<16x128xf32>
    %218 = arith.maximumf %216, %217 : vector<16x128xf32>
    %219 = arith.maximumf %218, %213 : vector<16x128xf32>
    %c1_i32_76 = arith.constant 1 : i32
    %220 = tpu.dynamic_rotate %219 by %c1_i32_76 dim 1 : vector<16x128xf32>, i32 -> vector<16x128xf32>
    %c127_i32_77 = arith.constant 127 : i32
    %221 = tpu.dynamic_rotate %219 by %c127_i32_77 dim 1 : vector<16x128xf32>, i32 -> vector<16x128xf32>
    %222 = arith.maximumf %220, %221 : vector<16x128xf32>
    %223 = arith.maximumf %222, %219 : vector<16x128xf32>
    %224 = arith.subf %201, %223 : vector<16x128xf32>
    %cst_78 = arith.constant 0.000000e+00 : f32
    %225 = vector.broadcast %cst_78 : f32 to vector<16x128xf32>
    %226 = arith.maximumf %224, %225 : vector<16x128xf32>
    %227 = arith.mulf %189, %226 : vector<16x128xf32>
    %228 = arith.subf %226, %227 : vector<16x128xf32>
    %cst_79 = arith.constant 0.000000e+00 : f32
    %229 = vector.broadcast %cst_79 : f32 to vector<16x128xf32>
    %230 = arith.maximumf %228, %229 : vector<16x128xf32>
    %231 = arith.addf %189, %230 : vector<16x128xf32>
    %c1_i32_80 = arith.constant 1 : i32
    %232 = tpu.dynamic_rotate %201 by %c1_i32_80 dim 0 : vector<16x128xf32>, i32 -> vector<16x128xf32>
    %233 = arith.select %3, %201, %232 : vector<16x128xi1>, vector<16x128xf32>
    %c15_i32_81 = arith.constant 15 : i32
    %234 = tpu.dynamic_rotate %201 by %c15_i32_81 dim 0 : vector<16x128xf32>, i32 -> vector<16x128xf32>
    %235 = arith.select %5, %201, %234 : vector<16x128xi1>, vector<16x128xf32>
    %c1_i32_82 = arith.constant 1 : i32
    %236 = tpu.dynamic_rotate %201 by %c1_i32_82 dim 1 : vector<16x128xf32>, i32 -> vector<16x128xf32>
    %237 = arith.select %7, %201, %236 : vector<16x128xi1>, vector<16x128xf32>
    %c127_i32_83 = arith.constant 127 : i32
    %238 = tpu.dynamic_rotate %201 by %c127_i32_83 dim 1 : vector<16x128xf32>, i32 -> vector<16x128xf32>
    %239 = arith.select %9, %201, %238 : vector<16x128xi1>, vector<16x128xf32>
    %240 = arith.minimumf %233, %235 : vector<16x128xf32>
    %241 = arith.minimumf %237, %239 : vector<16x128xf32>
    %242 = arith.minimumf %240, %241 : vector<16x128xf32>
    %243 = arith.minimumf %242, %201 : vector<16x128xf32>
    %c1_i32_84 = arith.constant 1 : i32
    %244 = tpu.dynamic_rotate %243 by %c1_i32_84 dim 0 : vector<16x128xf32>, i32 -> vector<16x128xf32>
    %245 = arith.select %3, %243, %244 : vector<16x128xi1>, vector<16x128xf32>
    %c15_i32_85 = arith.constant 15 : i32
    %246 = tpu.dynamic_rotate %243 by %c15_i32_85 dim 0 : vector<16x128xf32>, i32 -> vector<16x128xf32>
    %247 = arith.select %5, %243, %246 : vector<16x128xi1>, vector<16x128xf32>
    %c1_i32_86 = arith.constant 1 : i32
    %248 = tpu.dynamic_rotate %243 by %c1_i32_86 dim 1 : vector<16x128xf32>, i32 -> vector<16x128xf32>
    %249 = arith.select %7, %243, %248 : vector<16x128xi1>, vector<16x128xf32>
    %c127_i32_87 = arith.constant 127 : i32
    %250 = tpu.dynamic_rotate %243 by %c127_i32_87 dim 1 : vector<16x128xf32>, i32 -> vector<16x128xf32>
    %251 = arith.select %9, %243, %250 : vector<16x128xi1>, vector<16x128xf32>
    %252 = arith.minimumf %245, %247 : vector<16x128xf32>
    %253 = arith.minimumf %249, %251 : vector<16x128xf32>
    %254 = arith.minimumf %252, %253 : vector<16x128xf32>
    %255 = arith.minimumf %254, %243 : vector<16x128xf32>
    %c1_i32_88 = arith.constant 1 : i32
    %256 = tpu.dynamic_rotate %255 by %c1_i32_88 dim 0 : vector<16x128xf32>, i32 -> vector<16x128xf32>
    %c15_i32_89 = arith.constant 15 : i32
    %257 = tpu.dynamic_rotate %255 by %c15_i32_89 dim 0 : vector<16x128xf32>, i32 -> vector<16x128xf32>
    %258 = arith.select %3, %255, %256 : vector<16x128xi1>, vector<16x128xf32>
    %259 = arith.select %5, %255, %257 : vector<16x128xi1>, vector<16x128xf32>
    %260 = arith.maximumf %258, %259 : vector<16x128xf32>
    %261 = arith.maximumf %260, %255 : vector<16x128xf32>
    %c1_i32_90 = arith.constant 1 : i32
    %262 = tpu.dynamic_rotate %261 by %c1_i32_90 dim 1 : vector<16x128xf32>, i32 -> vector<16x128xf32>
    %c127_i32_91 = arith.constant 127 : i32
    %263 = tpu.dynamic_rotate %261 by %c127_i32_91 dim 1 : vector<16x128xf32>, i32 -> vector<16x128xf32>
    %264 = arith.maximumf %262, %263 : vector<16x128xf32>
    %265 = arith.maximumf %264, %261 : vector<16x128xf32>
    %266 = arith.subf %243, %265 : vector<16x128xf32>
    %cst_92 = arith.constant 0.000000e+00 : f32
    %267 = vector.broadcast %cst_92 : f32 to vector<16x128xf32>
    %268 = arith.maximumf %266, %267 : vector<16x128xf32>
    %269 = arith.mulf %231, %268 : vector<16x128xf32>
    %270 = arith.subf %268, %269 : vector<16x128xf32>
    %cst_93 = arith.constant 0.000000e+00 : f32
    %271 = vector.broadcast %cst_93 : f32 to vector<16x128xf32>
    %272 = arith.maximumf %270, %271 : vector<16x128xf32>
    %273 = arith.addf %231, %272 : vector<16x128xf32>
    %c1_i32_94 = arith.constant 1 : i32
    %274 = tpu.dynamic_rotate %243 by %c1_i32_94 dim 0 : vector<16x128xf32>, i32 -> vector<16x128xf32>
    %275 = arith.select %3, %243, %274 : vector<16x128xi1>, vector<16x128xf32>
    %c15_i32_95 = arith.constant 15 : i32
    %276 = tpu.dynamic_rotate %243 by %c15_i32_95 dim 0 : vector<16x128xf32>, i32 -> vector<16x128xf32>
    %277 = arith.select %5, %243, %276 : vector<16x128xi1>, vector<16x128xf32>
    %c1_i32_96 = arith.constant 1 : i32
    %278 = tpu.dynamic_rotate %243 by %c1_i32_96 dim 1 : vector<16x128xf32>, i32 -> vector<16x128xf32>
    %279 = arith.select %7, %243, %278 : vector<16x128xi1>, vector<16x128xf32>
    %c127_i32_97 = arith.constant 127 : i32
    %280 = tpu.dynamic_rotate %243 by %c127_i32_97 dim 1 : vector<16x128xf32>, i32 -> vector<16x128xf32>
    %281 = arith.select %9, %243, %280 : vector<16x128xi1>, vector<16x128xf32>
    %282 = arith.minimumf %275, %277 : vector<16x128xf32>
    %283 = arith.minimumf %279, %281 : vector<16x128xf32>
    %284 = arith.minimumf %282, %283 : vector<16x128xf32>
    %285 = arith.minimumf %284, %243 : vector<16x128xf32>
    %c1_i32_98 = arith.constant 1 : i32
    %286 = tpu.dynamic_rotate %285 by %c1_i32_98 dim 0 : vector<16x128xf32>, i32 -> vector<16x128xf32>
    %287 = arith.select %3, %285, %286 : vector<16x128xi1>, vector<16x128xf32>
    %c15_i32_99 = arith.constant 15 : i32
    %288 = tpu.dynamic_rotate %285 by %c15_i32_99 dim 0 : vector<16x128xf32>, i32 -> vector<16x128xf32>
    %289 = arith.select %5, %285, %288 : vector<16x128xi1>, vector<16x128xf32>
    %c1_i32_100 = arith.constant 1 : i32
    %290 = tpu.dynamic_rotate %285 by %c1_i32_100 dim 1 : vector<16x128xf32>, i32 -> vector<16x128xf32>
    %291 = arith.select %7, %285, %290 : vector<16x128xi1>, vector<16x128xf32>
    %c127_i32_101 = arith.constant 127 : i32
    %292 = tpu.dynamic_rotate %285 by %c127_i32_101 dim 1 : vector<16x128xf32>, i32 -> vector<16x128xf32>
    %293 = arith.select %9, %285, %292 : vector<16x128xi1>, vector<16x128xf32>
    %294 = arith.minimumf %287, %289 : vector<16x128xf32>
    %295 = arith.minimumf %291, %293 : vector<16x128xf32>
    %296 = arith.minimumf %294, %295 : vector<16x128xf32>
    %297 = arith.minimumf %296, %285 : vector<16x128xf32>
    %c1_i32_102 = arith.constant 1 : i32
    %298 = tpu.dynamic_rotate %297 by %c1_i32_102 dim 0 : vector<16x128xf32>, i32 -> vector<16x128xf32>
    %c15_i32_103 = arith.constant 15 : i32
    %299 = tpu.dynamic_rotate %297 by %c15_i32_103 dim 0 : vector<16x128xf32>, i32 -> vector<16x128xf32>
    %300 = arith.select %3, %297, %298 : vector<16x128xi1>, vector<16x128xf32>
    %301 = arith.select %5, %297, %299 : vector<16x128xi1>, vector<16x128xf32>
    %302 = arith.maximumf %300, %301 : vector<16x128xf32>
    %303 = arith.maximumf %302, %297 : vector<16x128xf32>
    %c1_i32_104 = arith.constant 1 : i32
    %304 = tpu.dynamic_rotate %303 by %c1_i32_104 dim 1 : vector<16x128xf32>, i32 -> vector<16x128xf32>
    %c127_i32_105 = arith.constant 127 : i32
    %305 = tpu.dynamic_rotate %303 by %c127_i32_105 dim 1 : vector<16x128xf32>, i32 -> vector<16x128xf32>
    %306 = arith.maximumf %304, %305 : vector<16x128xf32>
    %307 = arith.maximumf %306, %303 : vector<16x128xf32>
    %308 = arith.subf %285, %307 : vector<16x128xf32>
    %cst_106 = arith.constant 0.000000e+00 : f32
    %309 = vector.broadcast %cst_106 : f32 to vector<16x128xf32>
    %310 = arith.maximumf %308, %309 : vector<16x128xf32>
    %311 = arith.mulf %273, %310 : vector<16x128xf32>
    %312 = arith.subf %310, %311 : vector<16x128xf32>
    %cst_107 = arith.constant 0.000000e+00 : f32
    %313 = vector.broadcast %cst_107 : f32 to vector<16x128xf32>
    %314 = arith.maximumf %312, %313 : vector<16x128xf32>
    %315 = arith.addf %273, %314 : vector<16x128xf32>
    %316 = arith.mulf %164, %11 : vector<16x128xf32>
    %317 = vector.shape_cast %316 : vector<16x128xf32> to vector<1x16x128xf32>
    %cst_108 = arith.constant dense<0.000000e+00> : vector<1xf32>
    %318 = vector.multi_reduction <add>, %317, %cst_108 [1, 2] : vector<1x16x128xf32> to vector<1xf32>
    %319 = vector.shape_cast %318 : vector<1xf32> to vector<1x1x1xf32>
    %320 = vector.extract %319[0, 0, 0] : f32 from vector<1x1x1xf32>
    %321 = vector.shape_cast %164 : vector<16x128xf32> to vector<1x16x128xf32>
    %cst_109 = arith.constant dense<0.000000e+00> : vector<1xf32>
    %322 = vector.multi_reduction <add>, %321, %cst_109 [1, 2] : vector<1x16x128xf32> to vector<1xf32>
    %323 = vector.shape_cast %322 : vector<1xf32> to vector<1x1x1xf32>
    %324 = vector.extract %323[0, 0, 0] : f32 from vector<1x1x1xf32>
    %325 = arith.mulf %315, %13 : vector<16x128xf32>
    %326 = vector.shape_cast %325 : vector<16x128xf32> to vector<1x16x128xf32>
    %cst_110 = arith.constant dense<0.000000e+00> : vector<1xf32>
    %327 = vector.multi_reduction <add>, %326, %cst_110 [1, 2] : vector<1x16x128xf32> to vector<1xf32>
    %328 = vector.shape_cast %327 : vector<1xf32> to vector<1x1x1xf32>
    %329 = vector.extract %328[0, 0, 0] : f32 from vector<1x1x1xf32>
    %330 = vector.shape_cast %315 : vector<16x128xf32> to vector<1x16x128xf32>
    %cst_111 = arith.constant dense<0.000000e+00> : vector<1xf32>
    %331 = vector.multi_reduction <add>, %330, %cst_111 [1, 2] : vector<1x16x128xf32> to vector<1xf32>
    %332 = vector.shape_cast %331 : vector<1xf32> to vector<1x1x1xf32>
    %333 = vector.extract %332[0, 0, 0] : f32 from vector<1x1x1xf32>
    %334 = tpu.iota {dimensions = array<i32: 1>} : vector<1x4xi32>
    %c0_i32_112 = arith.constant 0 : i32
    %335 = vector.broadcast %c0_i32_112 : i32 to vector<1x4xi32>
    %336 = arith.cmpi eq, %334, %335 : vector<1x4xi32>
    %cst_113 = arith.constant 0.000000e+00 : f32
    %337 = vector.broadcast %320 : f32 to vector<1x4xf32>
    %338 = vector.broadcast %cst_113 : f32 to vector<1x4xf32>
    %339 = arith.select %336, %337, %338 : vector<1x4xi1>, vector<1x4xf32>
    %c1_i32_114 = arith.constant 1 : i32
    %340 = vector.broadcast %c1_i32_114 : i32 to vector<1x4xi32>
    %341 = arith.cmpi eq, %334, %340 : vector<1x4xi32>
    %cst_115 = arith.constant 0.000000e+00 : f32
    %342 = vector.broadcast %324 : f32 to vector<1x4xf32>
    %343 = vector.broadcast %cst_115 : f32 to vector<1x4xf32>
    %344 = arith.select %341, %342, %343 : vector<1x4xi1>, vector<1x4xf32>
    %345 = arith.addf %339, %344 : vector<1x4xf32>
    %c2_i32 = arith.constant 2 : i32
    %346 = vector.broadcast %c2_i32 : i32 to vector<1x4xi32>
    %347 = arith.cmpi eq, %334, %346 : vector<1x4xi32>
    %cst_116 = arith.constant 0.000000e+00 : f32
    %348 = vector.broadcast %329 : f32 to vector<1x4xf32>
    %349 = vector.broadcast %cst_116 : f32 to vector<1x4xf32>
    %350 = arith.select %347, %348, %349 : vector<1x4xi1>, vector<1x4xf32>
    %351 = arith.addf %345, %350 : vector<1x4xf32>
    %c3_i32 = arith.constant 3 : i32
    %352 = vector.broadcast %c3_i32 : i32 to vector<1x4xi32>
    %353 = arith.cmpi eq, %334, %352 : vector<1x4xi32>
    %cst_117 = arith.constant 0.000000e+00 : f32
    %354 = vector.broadcast %333 : f32 to vector<1x4xf32>
    %355 = vector.broadcast %cst_117 : f32 to vector<1x4xf32>
    %356 = arith.select %353, %354, %355 : vector<1x4xi1>, vector<1x4xf32>
    %357 = arith.addf %351, %356 : vector<1x4xf32>
    %c0_118 = arith.constant 0 : index
    %c0_119 = arith.constant 0 : index
    %c0_120 = arith.constant 0 : index
    %c0_121 = arith.constant 0 : index
    %358 = vector.load %arg4[%c0_118, %c0_119, %c0_120, %c0_121] : memref<1x1x1x4xf32, #tpu.memory_space<vmem>>, vector<1x1x1x4xf32>
    %359 = vector.shape_cast %358 : vector<1x1x1x4xf32> to vector<1x4xf32>
    %360 = vector.shape_cast %357 : vector<1x4xf32> to vector<1x1x1x4xf32>
    tpu.vector_store %arg4[%c0_118, %c0_119, %c0_120, %c0_121], %360 {strides = array<i32>} : memref<1x1x1x4xf32, #tpu.memory_space<vmem>>, vector<1x1x1x4xf32>,
    return
  }
  func.func @transform_0(%arg0: i32, %arg1: i32) -> (i32, i32, i32, i32) {
    %c0_i32 = arith.constant 0 : i32
    %c0_i32_0 = arith.constant 0 : i32
    %c0_i32_1 = arith.constant 0 : i32
    return %arg0, %arg1, %c0_i32, %c0_i32_0 : i32, i32, i32, i32
  }
  func.func @transform_1(%arg0: i32, %arg1: i32) -> (i32, i32, i32, i32) {
    %c0_i32 = arith.constant 0 : i32
    %c0_i32_0 = arith.constant 0 : i32
    %c0_i32_1 = arith.constant 0 : i32
    return %arg0, %arg1, %c0_i32, %c0_i32_0 : i32, i32, i32, i32
  }
  func.func @transform_2(%arg0: i32, %arg1: i32) -> (i32, i32, i32, i32) {
    %c0_i32 = arith.constant 0 : i32
    %c0_i32_0 = arith.constant 0 : i32
    %c0_i32_1 = arith.constant 0 : i32
    return %arg0, %arg1, %c0_i32, %c0_i32_0 : i32, i32, i32, i32
  }
}

</mosaic_0001>

<bundles_post_ra>
// kernel: tpu_custom_call.1
= control target key start
LH: loop header
LB: loop body
LE: loop exit
PB: predicated region body
PF: predicated region fallthrough
CT: control target
= control target key end

     0   :  { %s2047_s0 = inlined_call_operand.hbm [shape: f32[2,3,16,128], index: 0, kind: input, shape index: {}]   ;;  %s2048_s1 = inlined_call_operand.hbm [shape: f32[2,3,16,128], index: 1, kind: input, shape index: {}]   ;;  %s2049_s2 = inlined_call_operand.hbm [shape: f32[2,3,1,4], index: 2, kind: output, shape index: {}]  }
   0x1   :  { %2053 = sst [smem:[#allocation13_spill]] %s2047_s0 }
   0x2   :  { %7 = vsyncpa [#allocation3], 0 }
   0x3   :  { %9 = vsyncpa [#allocation3 + $0x1], 0 }
   0x4   :  { %10 = vsyncpa [#allocation6], 0 }
   0x5   :  { %12 = vsyncpa [#allocation6 + $0x1], 0 }
   0x6   :  { %13 = vsyncpa [#allocation4], 0 }
   0x7   :  { %15 = vsyncpa [#allocation4 + $0x1], 0  ;;  %s1205_s9 = smov 0   ;;  %s1207_s10 = smov 0  }
   0x8   :  { %s1209_s11 = smov 0   ;;  %s1211_s12 = smov 0  }
   0x9   :  { %s1213_s13 = smov 0   ;;  %s1215_s14 = smov 0  }
   0xa   :  { %s1217_s15 = smov 0   ;;  %s1219_s16 = smov 0  }
   0xb LB: > { %s911_s17 = sadd.s32 4294967295, %s1181_s16   ;;  %s912_s18 = sadd.s32 4294967294, %s1181_s16   ;;  %s1181_s16 = sphi %s1219_s16, %s21_s16   ;;  %s1177_s15 = sphi %s1217_s15, %s2072_s15   ;;  %s1173_s14 = sphi %s1215_s14, %s2071_s14   ;;  %s1169_s13 = sphi %s1213_s13, %s2070_s13   ;;  %s1165_s12 = sphi %s1211_s12, %s2069_s12   ;;  %s1161_s11 = sphi %s1209_s11, %s2068_s11   ;;  %s1157_s10 = sphi %s1207_s10, %s2067_s10   ;;  %s1153_s9 = sphi %s1205_s9, %s2066_s9  }
   0xc   : > { %s30_s19 = sadd.s32 1, %s1173_s14  ;;  %s33_s20 = sadd.s32 1, %s1177_s15 }
   0xd   : > { %p31_p0 = scmp.ge.s32.totalorder %s30_s19, 3  ;;  %s42_s21 = sadd.s32 1, %s1161_s11 }
   0xe   : > { %p49_p1 = scmp.ne.s32.totalorder %s1161_s11, %s1157_s10  ;;  %p50_p2 = scmp.eq.s32.totalorder %s1181_s16, 0 }
   0xf   : > { %s2074_s19 = smov (%p31_p0, %s30_s19), 0  ;;  %s2076_s20 = smov (!%p31_p0, %s33_s20), %s1177_s15 }
  0x10   : > { %2054 = sst [smem:[#allocation11_spill]] %s2074_s19  ;;  %s38_s22 = ssub.s32 %s1173_s14, %s2074_s19 }
  0x11   : > { %p1258_p3 = por %p50_p2, %p49_p1  ;;  %p35_p4 = scmp.ge.s32.totalorder %s2076_s20, 2 }
  0x12   : > { %p55_p5 = scmp.ne.s32.totalorder %s1157_s10, %s1153_s9  ;;  %p56_p6 = scmp.eq.s32.totalorder %s911_s17, 0 }
  0x13   : > { %p109_p7 = scmp.eq.s32.totalorder %s911_s17, 5  ;;  %s2078_s20 = smov (%p35_p4, %s2076_s20), 0 }
  0x14   : > { %2056 = sst [smem:[#allocation12_spill]] %s2078_s20  ;;  %p1266_p8 = por %p56_p6, %p55_p5 }
  0x15   : > { %p1270_p9 = por %p109_p7, %p49_p1  ;;  %s37_s26 = ssub.s32 %s1177_s15, %s2078_s20 }
  0x16   : > { %p115_p10 = scmp.eq.s32.totalorder %s912_s18, 5  ;;  %s39_s27 = sor.u32 %s38_s22, %s37_s26 }
  0x17   : > { %p40_p11 = scmp.eq.s32.totalorder %s39_s27, 0  ;;  %p955_p13 = scmp.lt.s32.totalorder %s1181_s16, 6 }
  0x18   : > { %p1276_p12 = por %p115_p10, %p55_p5  ;;  %s1282_s29 = sand.u32 1, %s1161_s11  }
  0x19   : > { %s1285_s30 = scalar_select %p40_p11, %s1161_s11, %s42_s21  }
  0x1a   : > { %s2051_s3 = sshll.u32 %s1282_s29, 4  ;;  %s916_s4 = sshll.u32 %s1173_s14, 1 }
  0x1b   : > { %s927_s5 = smul.u32 6, %s1177_s15  ;;  %s139_s6 = scalar_lea.vmem [#allocation2], %s2051_s3 }
  0x1c   : > { %s148_s7 = sshll.u32 %s139_s6, 4  ;;  %p1294_p0 = pnand %p955_p13, %p1258_p3  ;;  %s149_s7 = int_to_ptr.vmem [resolvable:$true] %s148_s7 }
  0x1d   : > { %s145_s17 = sadd.s32 %s927_s5, %s916_s4  ;;  %s2061_s0 = sld [smem:[#allocation13_spill]] }
  0x1e   : > { %s917_s18 = sshll.u32 %s145_s17, 7  ;;  %s136_s27 = scalar_lea.sflag [#allocation3], %s1282_s29 }
  0x1f   : > { %p1027_p1 = pneg %p1294_p0  ;;  %s1038_s20 = scalar_lea.vmem %s149_s7, 256 }
  0x20   : > { %p1039_p2 = scmp.ne.s32.totalorder %s149_s7, %s1038_s20  ;;  %s1183_s23 = smov [#allocation2]  }
  0x21   : > { %s1043_s6 = sshll.u32 %s1183_s23, 4  ;;  %s1044_s6 = int_to_ptr.vmem [resolvable:$false] %s1043_s6 }
  0x22   : > { %p1041_p4 = pnand %p1039_p2, %p1027_p1  ;;  %s1045_s3 = scalar_lea.vmem %s1044_s6, 512 }
  0x23   : > { %s147_s21 = scalar_lea.hbm %s2061_s0, %s917_s18  ;;  %p1046_p5 = scmp.lt.s32.totalorder %s149_s7, %s1044_s6 }
  0x24   : > { %p1042_p3 = pneg %p1041_p4  ;;  %p1047_p6 = scmp.lt.s32.totalorder %s1045_s3, %s1038_s20 }
  0x26   : > { %p1048_p7 = por %p1047_p6, %p1046_p5 }
  0x28   : > { %p1049_p10 = pnand %p1048_p7, %p1042_p3 }
  0x2a   : > { %1052 = shalt.err (!%p1049_p10)
}
  0x2b   : > { %s1184_s4 = smov 128   ;;  %s1185_s5 = smov 8  }
  0x2c   : > { %947 = dma.hbm_to_vmem [thread:$0]  (!%p1294_p0), %s147_s21, 256, %s149_s7, %s136_s27, %s1184_s4, %s1184_s4, %s1185_s5  }
  0x2d   : > { %p921_p11 = scmp.ge.s32.totalorder %s1181_s16, 1  ;;  %p179_p13 = scmp.lt.s32.totalorder %s1181_s16, 7 }
  0x2e   : > { %s170_s22 = scalar_lea.hbm %s2048_s1, %s917_s18  ;;  %s2063_s26 = sshll.u32 %s1282_s29, 4 }
  0x2f   : > { %p1311_p2 = pnand %p921_p11, %p179_p13  ;;  %s162_s23 = scalar_lea.vmem [#allocation5], %s2063_s26 }
  0x30   : > { %s171_s6 = sshll.u32 %s162_s23, 4  ;;  %s159_s0 = scalar_lea.sflag [#allocation6], %s1282_s29  ;;  %s172_s6 = int_to_ptr.vmem [resolvable:$true] %s171_s6 }
  0x31   : > { %s1066_s19 = scalar_lea.vmem %s172_s6, 256  ;;  %s1186_s7 = smov [#allocation5]  }
  0x32   : > { %p1067_p4 = scmp.ne.s32.totalorder %s172_s6, %s1066_s19  ;;  %s1071_s21 = sshll.u32 %s1186_s7, 4  ;;  %s1072_s21 = int_to_ptr.vmem [resolvable:$false] %s1071_s21 }
  0x33   : > { %s1073_s27 = scalar_lea.vmem %s1072_s21, 512  ;;  %p1074_p6 = scmp.lt.s32.totalorder %s172_s6, %s1072_s21 }
  0x34   : > { %p1069_p3 = pnand %p1067_p4, %p1027_p1  ;;  %p1075_p7 = scmp.lt.s32.totalorder %s1073_s27, %s1066_s19 }
  0x36   : > { %p1070_p5 = pneg %p1069_p3  ;;  %p1076_p10 = por %p1075_p7, %p1074_p6 }
  0x38   : > { %p1077_p11 = pnand %p1076_p10, %p1070_p5 }
  0x3a   : > { %1080 = shalt.err (!%p1077_p11)
}
  0x3b   : > { %950 = dma.hbm_to_vmem [thread:$0]  (!%p1294_p0), %s170_s22, 256, %s172_s6, %s159_s0, %s1184_s4, %s1184_s4, %s1185_s5  }
  0x3c   : > { %183 = sbr.rel (%p1311_p2) target bundleno = 950 (0x3b6), region = 28  ;;  %s1329_s29 = sand.u32 (!%p1311_p2), 1, %s1157_s10  }
  0x3d   : > { %s922_s18 = sshll.u32 (!%p1311_p2), %s1329_s29, 4  ;;  %s186_s20 = scalar_lea.sflag (!%p1311_p2), [#allocation3], %s1329_s29 }
  0x3e   : > { %s189_s3 = scalar_lea.vmem (!%p1311_p2), [#allocation2], %s922_s18 }
  0x41   : > { %1140 = dma.done.wait (%p1266_p8), %s186_s20, 256  }
  0x42   : > { %1142 = vsyncadd (%p1266_p8), %s186_s20, 4294967040  ;;  %s195_s0 = scalar_lea.sflag [#allocation6], %s1329_s29  ;;  %s198_s19 = scalar_lea.vmem [#allocation5], %s922_s18 }
  0x43   : > { %1144 = dma.done.wait (%p1266_p8), %s195_s0, 256  }
  0x44   : > { %1146 = vsyncadd (%p1266_p8), %s195_s0, 4294967040  ;;  %v1342_v0 = vld [vmem:[%s198_s19] sm:$0xff]  ;;  %s1187_s8 = smov 127   ;;  %s1188_s4 = smov 1   ;;  %v1348_v1 = vld [vmem:[%s198_s19 + $0x8] sm:$0xff]  ;;  %v223_v4 = vlaneseq  ;;  %vm786_vm9 = vcmask 24576  }
  0x45   : > { %258 = vrot.lane.b32.xlu1 %v1342_v0, %s1187_s8  ;;  %252 = vrot.lane.b32.xlu0 %v1342_v0, %s1188_s4  ;;  %v1354_v2 = vld [vmem:[%s189_s3 + $0x8] sm:$0xff]  ;;  %v1356_v3 = vld [vmem:[%s189_s3] sm:$0xff]  ;;  %v239_v6 = vrot.slane %v1348_v1, 7  ;;  %v238_v7 = vrot.slane %v1342_v0, 7  ;;  %v246_v9 = vrot.slane %v1348_v1, 1  ;;  %v245_v10 = vrot.slane %v1342_v0, 1 }
  0x46   : > { %v1366_v5 = vshrl.u32 %v223_v4, 7  ;;  %v1371_v8 = vand.u32 127, %v223_v4  ;;  %v484_v16 = vrot.slane %v1356_v3, 7  ;;  %v485_v20 = vrot.slane %v1354_v2, 7  ;;  %s937_s17 = smul.u32 3, %s1169_s13  ;;  %s222_s6 = scalar_lea.vmem [#allocation7], %s1329_s29 }
  0x47   : > { %v490_v21 = vrot.slane %v1356_v3, 1  ;;  %v491_v22 = vrot.slane %v1354_v2, 1  ;;  %s803_s7 = sshll.u32 %s222_s6, 4  ;;  %s789_s18 = scalar_lea.sflag [#allocation4], %s1329_s29  ;;  %s804_s7 = int_to_ptr.vmem [resolvable:$true] %s803_s7 }
  0x48   : > { %vm240_vm0 = vcmp.lt.s32.totalorder %v1366_v5, 1  ;;  %vm228_vm1 = vcmp.eq.s32.totalorder %v1366_v5, 0  ;;  %vm247_vm2 = vcmp.lt.s32.totalorder %v1366_v5, 7  ;;  %v1380_v12 = vadd.s32 8, %v1366_v5  ;;  %s799_s26 = sadd.s32 %s1165_s12, %s937_s17  ;;  %s1081_s20 = scalar_lea.vmem %s804_s7, 16 }
  0x49   : > { %260 = vrot.lane.b32.xlu1 %v1348_v1, %s1187_s8  ;;  %254 = vrot.lane.b32.xlu0 %v1348_v1, %s1188_s4  ;;  %v242_v11 = vsel %vm240_vm0, %v239_v6, %v238_v7  ;;  %v248_v14 = vsel %vm247_vm2, %v245_v10, %v246_v9  ;;  %vm233_vm3 = vcmp.eq.s32.totalorder %v1371_v8, 15  ;;  %vm232_vm4 = vcmp.eq.s32.totalorder %v1371_v8, 0  ;;  %s924_s13 = sshll.u32 %s799_s26, 4  ;;  %p1082_p8 = scmp.ne.s32.totalorder %s804_s7, %s1081_s20 }
  0x4a   : > { %v243_v13 = vsel %vm228_vm1, %v1342_v0, %v242_v11  ;;  %vm231_vm5 = vcmp.eq.s32.totalorder %v1380_v12, 15  ;;  %v249_v15 = vsel %vm247_vm2, %v246_v9, %v245_v10  ;;  %v241_v25 = vsel %vm240_vm0, %v238_v7, %v239_v6  ;;  %s801_s12 = scalar_lea.hbm %s2049_s2, %s924_s13  ;;  %s1189_s3 = smov [#allocation7]  }
  0x4b   : > { %v264_v19 = vmin.f32 %v243_v13, %v248_v14  ;;  %v251_v26 = vsel %vm231_vm5, %v1348_v1, %v249_v15  ;;  %v493_v34 = vsel %vm247_vm2, %v491_v22, %v490_v21  ;;  %v487_v35 = vsel %vm240_vm0, %v485_v20, %v484_v16  ;;  %p1083_p0 = pnand %p1082_p8, %p1270_p9  ;;  %s1085_s0 = sshll.u32 %s1189_s3, 4  ;;  %s1086_s0 = int_to_ptr.vmem [resolvable:$false] %s1085_s0 }
  0x4c   : > { %v265_v31 = vmin.f32 %v241_v25, %v251_v26  ;;  %v486_v38 = vsel %vm240_vm0, %v484_v16, %v485_v20  ;;  %v495_v42 = vsel %vm231_vm5, %v1354_v2, %v493_v34  ;;  %v488_v43 = vsel %vm228_vm1, %v1356_v3, %v487_v35  ;;  %s1087_s19 = scalar_lea.vmem %s1086_s0, 32  ;;  %p1088_p13 = scmp.lt.s32.totalorder %s804_s7, %s1086_s0 }
  0x4d   : > { %498 = vrot.lane.b32.xlu1 %v1354_v2, %s1188_s4  ;;  %496 = vrot.lane.b32.xlu0 %v1356_v3, %s1188_s4  ;;  %v492_v44 = vsel %vm247_vm2, %v490_v21, %v491_v22  ;;  %v509_v46 = vmin.f32 %v486_v38, %v495_v42  ;;  %vm774_vm6 = vcmp.eq.s32.totalorder %v1371_v8, 1  ;;  %vm778_vm7 = vcmp.eq.s32.totalorder %v1371_v8, 2  ;;  %p1084_p1 = pneg %p1083_p0  ;;  %p1089_p2 = scmp.lt.s32.totalorder %s1087_s19, %s1081_s20 }
  0x4e   : > { %v508_v47 = vmin.f32 %v488_v43, %v492_v44  ;;  %vm782_vm8 = vcmp.eq.s32.totalorder %v1371_v8, 3 }
  0x4f   : > { %p1090_p4 = por %p1089_p2, %p1088_p13 }
  0x51   : > { %504 = vrot.lane.b32.xlu1 %v1354_v2, %s1187_s8  ;;  %502 = vrot.lane.b32.xlu0 %v1356_v3, %s1187_s8  ;;  %p1091_p3 = pnand %p1090_p4, %p1084_p1 }
  0xb7   : > { %v259_v17 = vpop.permute.xlu1 %258  ;;  %v253_v18 = vpop.permute.xlu0 %252 }
  0xb8   : > { %v262_v23 = vsel %vm233_vm3, %v1342_v0, %v259_v17  ;;  %v256_v24 = vsel %vm232_vm4, %v1342_v0, %v253_v18 }
  0xb9   : > { %v266_v27 = vmin.f32 %v256_v24, %v262_v23 }
  0xbb   : > { %v268_v28 = vmin.f32 %v264_v19, %v266_v27  ;;  %v261_v29 = vpop.permute.xlu1 %260  ;;  %v255_v30 = vpop.permute.xlu0 %254 }
  0xbc   : > { %v263_v32 = vsel %vm233_vm3, %v1348_v1, %v261_v29  ;;  %v257_v33 = vsel %vm232_vm4, %v1348_v1, %v255_v30 }
  0xbd   : > { %v1418_v36 = vmin.f32 %v268_v28, %v1342_v0  ;;  %v267_v37 = vmin.f32 %v257_v33, %v263_v32 }
  0xbf   : > { %v269_v39 = vmin.f32 %v265_v31, %v267_v37  ;;  %v499_v40 = vpop.permute.xlu1 %498  ;;  %304 = vrot.lane.b32.xlu0 %v1418_v36, %s1188_s4  ;;  %v497_v41 = vpop.permute.xlu0 %496  ;;  %v272_v50 = vrot.slane %v1418_v36, 7  ;;  %v276_v52 = vrot.slane %v1418_v36, 1 }
  0xc0   : > { %v501_v54 = vsel %vm232_vm4, %v1354_v2, %v499_v40  ;;  %v500_v55 = vsel %vm232_vm4, %v1356_v3, %v497_v41 }
  0xc1   : > { %v1433_v45 = vmin.f32 %v269_v39, %v1348_v1 }
  0xc3   : > { %306 = vrot.lane.b32.xlu1 %v1433_v45, %s1188_s4  ;;  %v505_v48 = vpop.permute.xlu1 %504  ;;  %310 = vrot.lane.b32.xlu0 %v1418_v36, %s1187_s8  ;;  %v503_v49 = vpop.permute.xlu0 %502  ;;  %v273_v51 = vrot.slane %v1433_v45, 7  ;;  %v277_v53 = vrot.slane %v1433_v45, 1 }
  0xc4   : > { %v507_v56 = vsel %vm233_vm3, %v1354_v2, %v505_v48  ;;  %v506_v57 = vsel %vm233_vm3, %v1356_v3, %v503_v49 }
  0xc5   : > { %v511_v58 = vmin.f32 %v501_v54, %v507_v56  ;;  %v510_v59 = vmin.f32 %v500_v55, %v506_v57  ;;  %v275_v60 = vsel %vm240_vm0, %v273_v51, %v272_v50  ;;  %v1459_v61 = vsel %vm247_vm2, %v276_v52, %v277_v53 }
  0xc6   : > { %v1464_v62 = vsel %vm228_vm1, %v1418_v36, %v275_v60  ;;  %v1468_v63 = vsel %vm240_vm0, %v272_v50, %v273_v51  ;;  %v279_v4 = vsel %vm247_vm2, %v277_v53, %v276_v52 }
  0xc7   : > { %v513_v6 = vmin.f32 %v509_v46, %v511_v58  ;;  %v512_v7 = vmin.f32 %v508_v47, %v510_v59  ;;  %312 = vrot.lane.b32.xlu1 %v1433_v45, %s1187_s8  ;;  %v1477_v9 = vsel %vm231_vm5, %v1433_v45, %v279_v4  ;;  %v284_v10 = vmax.f32 %v1464_v62, %v1459_v61 }
  0xc8   : > { %v285_v11 = vmax.f32 %v1468_v63, %v1477_v9  ;;  %v316_v32 = vmin.f32 %v1464_v62, %v1459_v61  ;;  %v317_v40 = vmin.f32 %v1468_v63, %v1477_v9 }
  0xc9   : > { %v1484_v13 = vmin.f32 %v513_v6, %v1354_v2  ;;  %v1487_v14 = vmin.f32 %v512_v7, %v1356_v3 }
  0xcb   : > { %548 = vrot.lane.b32.xlu0 %v1487_v14, %s1188_s4  ;;  %550 = vrot.lane.b32.xlu1 %v1484_v13, %s1188_s4  ;;  %v516_v15 = vrot.slane %v1487_v14, 7  ;;  %v517_v16 = vrot.slane %v1484_v13, 7  ;;  %v520_v17 = vrot.slane %v1487_v14, 1  ;;  %v521_v18 = vrot.slane %v1484_v13, 1 }
  0xcd   : > { %v519_v19 = vsel %vm240_vm0, %v517_v16, %v516_v15  ;;  %v1501_v20 = vsel %vm247_vm2, %v520_v17, %v521_v18  ;;  %v1505_v21 = vsel %vm240_vm0, %v516_v15, %v517_v16  ;;  %v523_v22 = vsel %vm247_vm2, %v521_v18, %v520_v17 }
  0xce   : > { %v1512_v23 = vsel %vm228_vm1, %v1487_v14, %v519_v19  ;;  %v1517_v24 = vsel %vm231_vm5, %v1484_v13, %v523_v22 }
  0xcf   : > { %554 = vrot.lane.b32.xlu0 %v1487_v14, %s1187_s8  ;;  %556 = vrot.lane.b32.xlu1 %v1484_v13, %s1187_s8  ;;  %v528_v25 = vmax.f32 %v1512_v23, %v1501_v20  ;;  %v529_v26 = vmax.f32 %v1505_v21, %v1517_v24  ;;  %v560_v53 = vmin.f32 %v1512_v23, %v1501_v20 }
  0xd0   : > { %v561_v55 = vmin.f32 %v1505_v21, %v1517_v24 }
  0xd1   : > { %v1801_v9 = vmax.f32 %v528_v25, %v1487_v14 }
 0x131   : > { %v305_v27 = vpop.permute.xlu0 %304 }
 0x132   : > { %v308_v30 = vsel %vm232_vm4, %v1418_v36, %v305_v27 }
 0x135   : > { %v307_v28 = vpop.permute.xlu1 %306  ;;  %v311_v29 = vpop.permute.xlu0 %310 }
 0x136   : > { %v314_v31 = vsel %vm233_vm3, %v1418_v36, %v311_v29  ;;  %v309_v37 = vsel %vm232_vm4, %v1433_v45, %v307_v28 }
 0x137   : > { %v318_v33 = vmin.f32 %v308_v30, %v314_v31 }
 0x139   : > { %v320_v34 = vmin.f32 %v316_v32, %v318_v33  ;;  %v313_v35 = vpop.permute.xlu1 %312 }
 0x13a   : > { %v315_v38 = vsel %vm233_vm3, %v1433_v45, %v313_v35 }
 0x13b   : > { %v1542_v39 = vmin.f32 %v320_v34, %v1418_v36  ;;  %v319_v41 = vmin.f32 %v309_v37, %v315_v38 }
 0x13d   : > { %v321_v42 = vmin.f32 %v317_v40, %v319_v41  ;;  %364 = vrot.lane.b32.xlu0 %v1542_v39, %s1188_s4  ;;  %v549_v43 = vpop.permute.xlu0 %548  ;;  %v551_v44 = vpop.permute.xlu1 %550  ;;  %v324_v6 = vrot.slane %v1542_v39, 7  ;;  %v328_v17 = vrot.slane %v1542_v39, 1 }
 0x13e   : > { %v552_v49 = vsel %vm232_vm4, %v1487_v14, %v549_v43  ;;  %v553_v50 = vsel %vm232_vm4, %v1484_v13, %v551_v44 }
 0x13f   : > { %v1549_v46 = vmin.f32 %v321_v42, %v1433_v45 }
 0x141   : > { %370 = vrot.lane.b32.xlu0 %v1542_v39, %s1187_s8  ;;  %v555_v47 = vpop.permute.xlu0 %554  ;;  %366 = vrot.lane.b32.xlu1 %v1549_v46, %s1188_s4  ;;  %v557_v48 = vpop.permute.xlu1 %556  ;;  %v325_v4 = vrot.slane %v1549_v46, 7  ;;  %v329_v7 = vrot.slane %v1549_v46, 1 }
 0x142   : > { %v558_v51 = vsel %vm233_vm3, %v1487_v14, %v555_v47  ;;  %v559_v52 = vsel %vm233_vm3, %v1484_v13, %v557_v48 }
 0x143   : > { %v562_v54 = vmin.f32 %v552_v49, %v558_v51  ;;  %v563_v56 = vmin.f32 %v553_v50, %v559_v52  ;;  %v327_v16 = vsel %vm240_vm0, %v325_v4, %v324_v6  ;;  %v1595_v18 = vsel %vm247_vm2, %v328_v17, %v329_v7 }
 0x144   : > { %v1600_v19 = vsel %vm228_vm1, %v1542_v39, %v327_v16  ;;  %v331_v28 = vsel %vm247_vm2, %v329_v7, %v328_v17  ;;  %v1618_v38 = vsel %vm240_vm0, %v324_v6, %v325_v4 }
 0x145   : > { %v564_v57 = vmin.f32 %v560_v53, %v562_v54  ;;  %v565_v58 = vmin.f32 %v561_v55, %v563_v56  ;;  %372 = vrot.lane.b32.xlu1 %v1549_v46, %s1187_s8  ;;  %v376_v35 = vmin.f32 %v1600_v19, %v1595_v18  ;;  %v1623_v40 = vsel %vm231_vm5, %v1549_v46, %v331_v28 }
 0x146   : > { %v377_v50 = vmin.f32 %v1618_v38, %v1623_v40  ;;  %v337_v61 = vmax.f32 %v1618_v38, %v1623_v40 }
 0x147   : > { %v1574_v59 = vmin.f32 %v564_v57, %v1487_v14  ;;  %v1577_v60 = vmin.f32 %v565_v58, %v1484_v13 }
 0x148   : > { %v1787_v63 = vmax.f32 %v337_v61, %v1549_v46 }
 0x149   : > { %608 = vrot.lane.b32.xlu0 %v1574_v59, %s1188_s4  ;;  %610 = vrot.lane.b32.xlu1 %v1577_v60, %s1188_s4  ;;  %v568_v29 = vrot.slane %v1574_v59, 7  ;;  %v569_v30 = vrot.slane %v1577_v60, 7  ;;  %v572_v33 = vrot.slane %v1574_v59, 1  ;;  %v573_v34 = vrot.slane %v1577_v60, 1 }
 0x14b   : > { %v571_v47 = vsel %vm240_vm0, %v569_v30, %v568_v29  ;;  %v575_v48 = vsel %vm247_vm2, %v573_v34, %v572_v33  ;;  %v1642_v52 = vsel %vm247_vm2, %v572_v33, %v573_v34  ;;  %v1653_v57 = vsel %vm240_vm0, %v568_v29, %v569_v30 }
 0x14c   : > { %v1649_v56 = vsel %vm228_vm1, %v1574_v59, %v571_v47  ;;  %v1658_v58 = vsel %vm231_vm5, %v1577_v60, %v575_v48 }
 0x14d   : > { %614 = vrot.lane.b32.xlu0 %v1574_v59, %s1187_s8  ;;  %616 = vrot.lane.b32.xlu1 %v1577_v60, %s1187_s8  ;;  %v620_v6 = vmin.f32 %v1649_v56, %v1642_v52  ;;  %v621_v7 = vmin.f32 %v1653_v57, %v1658_v58  ;;  %v581_v20 = vmax.f32 %v1653_v57, %v1658_v58 }
 0x14f   : > { %v1825_v23 = vmax.f32 %v581_v20, %v1577_v60 }
 0x1af   : > { %v365_v15 = vpop.permute.xlu0 %364 }
 0x1b0   : > { %v368_v31 = vsel %vm232_vm4, %v1542_v39, %v365_v15 }
 0x1b3   : > { %v371_v22 = vpop.permute.xlu0 %370  ;;  %v367_v27 = vpop.permute.xlu1 %366 }
 0x1b4   : > { %v374_v32 = vsel %vm233_vm3, %v1542_v39, %v371_v22  ;;  %v369_v43 = vsel %vm232_vm4, %v1549_v46, %v367_v27 }
 0x1b5   : > { %v378_v37 = vmin.f32 %v368_v31, %v374_v32 }
 0x1b7   : > { %v380_v41 = vmin.f32 %v376_v35, %v378_v37  ;;  %v373_v42 = vpop.permute.xlu1 %372 }
 0x1b8   : > { %v375_v44 = vsel %vm233_vm3, %v1549_v46, %v373_v42 }
 0x1b9   : > { %v1636_v49 = vmin.f32 %v380_v41, %v1542_v39  ;;  %v379_v51 = vmin.f32 %v369_v43, %v375_v44 }
 0x1bb   : > { %v381_v53 = vmin.f32 %v377_v50, %v379_v51  ;;  %424 = vrot.lane.b32.xlu0 %v1636_v49, %s1188_s4  ;;  %v609_v54 = vpop.permute.xlu0 %608  ;;  %v611_v55 = vpop.permute.xlu1 %610  ;;  %v384_v17 = vrot.slane %v1636_v49, 7  ;;  %v388_v27 = vrot.slane %v1636_v49, 1 }
 0x1bc   : > { %v612_v29 = vsel %vm232_vm4, %v1574_v59, %v609_v54  ;;  %v613_v30 = vsel %vm232_vm4, %v1577_v60, %v611_v55 }
 0x1bd   : > { %v1661_v4 = vmin.f32 %v381_v53, %v1549_v46 }
 0x1bf   : > { %430 = vrot.lane.b32.xlu0 %v1636_v49, %s1187_s8  ;;  %v615_v15 = vpop.permute.xlu0 %614  ;;  %426 = vrot.lane.b32.xlu1 %v1661_v4, %s1188_s4  ;;  %v617_v16 = vpop.permute.xlu1 %616  ;;  %v385_v22 = vrot.slane %v1661_v4, 7  ;;  %v389_v28 = vrot.slane %v1661_v4, 1 }
 0x1c0   : > { %v618_v31 = vsel %vm233_vm3, %v1574_v59, %v615_v15  ;;  %v619_v32 = vsel %vm233_vm3, %v1577_v60, %v617_v16 }
 0x1c1   : > { %v622_v33 = vmin.f32 %v612_v29, %v618_v31  ;;  %v623_v34 = vmin.f32 %v613_v30, %v619_v32  ;;  %v387_v35 = vsel %vm240_vm0, %v385_v22, %v384_v17  ;;  %v1691_v37 = vsel %vm247_vm2, %v388_v27, %v389_v28 }
 0x1c2   : > { %v1696_v41 = vsel %vm228_vm1, %v1636_v49, %v387_v35  ;;  %v1700_v42 = vsel %vm240_vm0, %v384_v17, %v385_v22  ;;  %v391_v43 = vsel %vm247_vm2, %v389_v28, %v388_v27  ;;  %v1763_v32 = vmax.f32 %v284_v10, %v1418_v36 }
 0x1c3   : > { %v624_v44 = vmin.f32 %v620_v6, %v622_v33  ;;  %v625_v47 = vmin.f32 %v621_v7, %v623_v34  ;;  %432 = vrot.lane.b32.xlu1 %v1661_v4, %s1187_s8  ;;  %v1709_v48 = vsel %vm231_vm5, %v1661_v4, %v391_v43  ;;  %v436_v50 = vmin.f32 %v1696_v41, %v1691_v37 }
 0x1c4   : > { %v437_v51 = vmin.f32 %v1700_v42, %v1709_v48  ;;  %v1769_v33 = vmax.f32 %v285_v11, %v1433_v45  ;;  %v336_v34 = vmax.f32 %v1600_v19, %v1595_v18  ;;  %v1807_v10 = vmax.f32 %v529_v26, %v1484_v13 }
 0x1c5   : > { %v1716_v53 = vmin.f32 %v624_v44, %v1574_v59  ;;  %v1719_v54 = vmin.f32 %v625_v47, %v1577_v60  ;;  %v580_v11 = vmax.f32 %v1649_v56, %v1642_v52  ;;  %v396_v24 = vmax.f32 %v1696_v41, %v1691_v37 }
 0x1c6   : > { %v1784_v62 = vmax.f32 %v336_v34, %v1542_v39  ;;  %v397_v25 = vmax.f32 %v1700_v42, %v1709_v48 }
 0x1c7   : > { %668 = vrot.lane.b32.xlu0 %v1716_v53, %s1188_s4  ;;  %670 = vrot.lane.b32.xlu1 %v1719_v54, %s1188_s4  ;;  %v628_v55 = vrot.slane %v1716_v53, 7  ;;  %v629_v6 = vrot.slane %v1719_v54, 7  ;;  %v632_v7 = vrot.slane %v1716_v53, 1  ;;  %v633_v15 = vrot.slane %v1719_v54, 1 }
 0x1c8   : > { %v1822_v21 = vmax.f32 %v580_v11, %v1574_v59  ;;  %v1840_v26 = vmax.f32 %v396_v24, %v1636_v49  ;;  %v1843_v18 = vmax.f32 %v397_v25, %v1661_v4 }
 0x1c9   : > { %v631_v16 = vsel %vm240_vm0, %v629_v6, %v628_v55  ;;  %v1733_v17 = vsel %vm247_vm2, %v632_v7, %v633_v15  ;;  %v1737_v22 = vsel %vm240_vm0, %v628_v55, %v629_v6  ;;  %v635_v27 = vsel %vm247_vm2, %v633_v15, %v632_v7 }
 0x1ca   : > { %v1744_v28 = vsel %vm228_vm1, %v1716_v53, %v631_v16  ;;  %v1749_v29 = vsel %vm231_vm5, %v1719_v54, %v635_v27 }
 0x1cb   : > { %674 = vrot.lane.b32.xlu0 %v1716_v53, %s1187_s8  ;;  %676 = vrot.lane.b32.xlu1 %v1719_v54, %s1187_s8  ;;  %v680_v30 = vmin.f32 %v1744_v28, %v1733_v17  ;;  %v681_v31 = vmin.f32 %v1737_v22, %v1749_v29  ;;  %v640_v19 = vmax.f32 %v1744_v28, %v1733_v17 }
 0x1cc   : > { %v641_v38 = vmax.f32 %v1737_v22, %v1749_v29 }
 0x1cd   : > { %v1858_v40 = vmax.f32 %v640_v19, %v1716_v53 }
 0x1ce   : > { %v1861_v52 = vmax.f32 %v641_v38, %v1719_v54 }
 0x1cf   : > { %288 = vrot.lane.b32.xlu0 %v1763_v32, %s1188_s4  ;;  %290 = vrot.lane.b32.xlu1 %v1769_v33, %s1188_s4 }
 0x1d3   : > { %292 = vrot.lane.b32.xlu0 %v1763_v32, %s1187_s8  ;;  %294 = vrot.lane.b32.xlu1 %v1769_v33, %s1187_s8 }
 0x1d7   : > { %340 = vrot.lane.b32.xlu0 %v1784_v62, %s1188_s4  ;;  %342 = vrot.lane.b32.xlu1 %v1787_v63, %s1188_s4 }
 0x1db   : > { %344 = vrot.lane.b32.xlu0 %v1784_v62, %s1187_s8  ;;  %346 = vrot.lane.b32.xlu1 %v1787_v63, %s1187_s8 }
 0x1df   : > { %532 = vrot.lane.b32.xlu0 %v1801_v9, %s1188_s4  ;;  %534 = vrot.lane.b32.xlu1 %v1807_v10, %s1188_s4 }
 0x1e3   : > { %536 = vrot.lane.b32.xlu0 %v1801_v9, %s1187_s8  ;;  %538 = vrot.lane.b32.xlu1 %v1807_v10, %s1187_s8 }
 0x1e7   : > { %584 = vrot.lane.b32.xlu0 %v1822_v21, %s1188_s4  ;;  %586 = vrot.lane.b32.xlu1 %v1825_v23, %s1188_s4 }
 0x1eb   : > { %588 = vrot.lane.b32.xlu0 %v1822_v21, %s1187_s8  ;;  %590 = vrot.lane.b32.xlu1 %v1825_v23, %s1187_s8 }
 0x1ef   : > { %400 = vrot.lane.b32.xlu0 %v1840_v26, %s1188_s4  ;;  %402 = vrot.lane.b32.xlu1 %v1843_v18, %s1188_s4 }
 0x1f3   : > { %404 = vrot.lane.b32.xlu0 %v1840_v26, %s1187_s8  ;;  %406 = vrot.lane.b32.xlu1 %v1843_v18, %s1187_s8 }
 0x1f7   : > { %644 = vrot.lane.b32.xlu0 %v1858_v40, %s1188_s4  ;;  %646 = vrot.lane.b32.xlu1 %v1861_v52, %s1188_s4 }
 0x1fb   : > { %648 = vrot.lane.b32.xlu0 %v1858_v40, %s1187_s8  ;;  %650 = vrot.lane.b32.xlu1 %v1861_v52, %s1187_s8 }
 0x22d   : > { %v425_v56 = vpop.permute.xlu0 %424 }
 0x22e   : > { %v428_v35 = vsel %vm232_vm4, %v1636_v49, %v425_v56 }
 0x231   : > { %v431_v57 = vpop.permute.xlu0 %430  ;;  %v427_v58 = vpop.permute.xlu1 %426 }
 0x232   : > { %v434_v43 = vsel %vm233_vm3, %v1636_v49, %v431_v57  ;;  %v429_v6 = vsel %vm232_vm4, %v1661_v4, %v427_v58 }
 0x233   : > { %v438_v44 = vmin.f32 %v428_v35, %v434_v43 }
 0x235   : > { %v440_v47 = vmin.f32 %v436_v50, %v438_v44  ;;  %v433_v55 = vpop.permute.xlu1 %432 }
 0x236   : > { %v435_v7 = vsel %vm233_vm3, %v1661_v4, %v433_v55 }
 0x237   : > { %v439_v15 = vmin.f32 %v429_v6, %v435_v7  ;;  %v442_v16 = vmin.f32 %v440_v47, %v1636_v49 }
 0x239   : > { %v441_v27 = vmin.f32 %v437_v51, %v439_v15  ;;  %v669_v34 = vpop.permute.xlu0 %668  ;;  %v671_v61 = vpop.permute.xlu1 %670  ;;  %v444_v11 = vrot.slane %v442_v16, 7  ;;  %v448_v24 = vrot.slane %v442_v16, 1 }
 0x23a   : > { %v672_v19 = vsel %vm232_vm4, %v1716_v53, %v669_v34  ;;  %v673_v38 = vsel %vm232_vm4, %v1719_v54, %v671_v61 }
 0x23b   : > { %v443_v37 = vmin.f32 %v441_v27, %v1661_v4 }
 0x23d   : > { %v675_v41 = vpop.permute.xlu0 %674  ;;  %v677_v50 = vpop.permute.xlu1 %676  ;;  %v445_v20 = vrot.slane %v443_v37, 7  ;;  %v449_v25 = vrot.slane %v443_v37, 1 }
 0x23e   : > { %v678_v42 = vsel %vm233_vm3, %v1716_v53, %v675_v41  ;;  %v679_v48 = vsel %vm233_vm3, %v1719_v54, %v677_v50 }
 0x23f   : > { %v682_v51 = vmin.f32 %v672_v19, %v678_v42  ;;  %v683_v56 = vmin.f32 %v673_v38, %v679_v48  ;;  %v447_v57 = vsel %vm240_vm0, %v445_v20, %v444_v11  ;;  %v450_v58 = vsel %vm247_vm2, %v448_v24, %v449_v25 }
 0x240   : > { %v452_v35 = vsel %vm228_vm1, %v442_v16, %v447_v57  ;;  %v446_v43 = vsel %vm240_vm0, %v444_v11, %v445_v20  ;;  %v451_v44 = vsel %vm247_vm2, %v449_v25, %v448_v24 }
 0x241   : > { %v684_v47 = vmin.f32 %v680_v30, %v682_v51  ;;  %v685_v55 = vmin.f32 %v681_v31, %v683_v56  ;;  %v456_v6 = vmax.f32 %v452_v35, %v450_v58  ;;  %v455_v7 = vsel %vm231_vm5, %v443_v37, %v451_v44  ;;  %v289_v5 = vpop.permute.xlu0 %288  ;;  %v291_v12 = vpop.permute.xlu1 %290 }
 0x242   : > { %v457_v15 = vmax.f32 %v446_v43, %v455_v7 }
 0x243   : > { %v686_v27 = vmin.f32 %v684_v47, %v1716_v53  ;;  %v687_v34 = vmin.f32 %v685_v55, %v1719_v54  ;;  %v1923_v61 = vmax.f32 %v456_v6, %v442_v16 }
 0x244   : > { %v1925_v41 = vmax.f32 %v457_v15, %v443_v37 }
 0x245   : > { %460 = vrot.lane.b32.xlu0 %v1923_v61, %s1188_s4  ;;  %v688_v17 = vrot.slane %v686_v27, 7  ;;  %v689_v28 = vrot.slane %v687_v34, 7  ;;  %v692_v22 = vrot.slane %v686_v27, 1  ;;  %v693_v29 = vrot.slane %v687_v34, 1  ;;  %v293_v38 = vpop.permute.xlu0 %292  ;;  %v295_v42 = vpop.permute.xlu1 %294 }
 0x246   : > { %462 = vrot.lane.b32.xlu1 %v1925_v41, %s1188_s4 }
 0x247   : > { %v691_v30 = vsel %vm240_vm0, %v689_v28, %v688_v17  ;;  %v694_v31 = vsel %vm247_vm2, %v692_v22, %v693_v29  ;;  %v690_v16 = vsel %vm240_vm0, %v688_v17, %v689_v28  ;;  %v695_v37 = vsel %vm247_vm2, %v693_v29, %v692_v22 }
 0x248   : > { %v696_v50 = vsel %vm228_vm1, %v686_v27, %v691_v30  ;;  %v699_v11 = vsel %vm231_vm5, %v687_v34, %v695_v37  ;;  %v296_v17 = vmax.f32 %v289_v5, %v293_v38  ;;  %v297_v22 = vmax.f32 %v291_v12, %v295_v42 }
 0x249   : > { %464 = vrot.lane.b32.xlu0 %v1923_v61, %s1187_s8  ;;  %v700_v20 = vmax.f32 %v696_v50, %v694_v31  ;;  %v701_v24 = vmax.f32 %v690_v16, %v699_v11  ;;  %v341_v48 = vpop.permute.xlu0 %340  ;;  %v343_v51 = vpop.permute.xlu1 %342 }
 0x24a   : > { %466 = vrot.lane.b32.xlu1 %v1925_v41, %s1187_s8  ;;  %v298_v31 = vmax.f32 %v296_v17, %v1763_v32  ;;  %v299_v16 = vmax.f32 %v297_v22, %v1769_v33 }
 0x24b   : > { %v1947_v25 = vmax.f32 %v700_v20, %v686_v27  ;;  %v1949_v19 = vmax.f32 %v701_v24, %v687_v34 }
 0x24c   : > { %v300_v5 = vsub.f32 %v1342_v0, %v298_v31  ;;  %v301_v12 = vsub.f32 %v1348_v1, %v299_v16 }
 0x24d   : > { %704 = vrot.lane.b32.xlu0 %v1947_v25, %s1188_s4  ;;  %v345_v56 = vpop.permute.xlu0 %344  ;;  %v347_v57 = vpop.permute.xlu1 %346 }
 0x24e   : > { %706 = vrot.lane.b32.xlu1 %v1949_v19, %s1188_s4  ;;  %v348_v15 = vmax.f32 %v341_v48, %v345_v56  ;;  %v349_v27 = vmax.f32 %v343_v51, %v347_v57  ;;  %v302_v56 = vmax.f32 %v300_v5, 0.0 }
 0x250   : > { %v350_v29 = vmax.f32 %v348_v15, %v1784_v62  ;;  %v351_v30 = vmax.f32 %v349_v27, %v1787_v63 }
 0x251   : > { %708 = vrot.lane.b32.xlu0 %v1947_v25, %s1187_s8  ;;  %v533_v58 = vpop.permute.xlu0 %532  ;;  %v535_v35 = vpop.permute.xlu1 %534 }
 0x252   : > { %710 = vrot.lane.b32.xlu1 %v1949_v19, %s1187_s8  ;;  %v352_v50 = vsub.f32 %v1418_v36, %v350_v29  ;;  %v353_v24 = vsub.f32 %v1433_v45, %v351_v30  ;;  %v303_v45 = vmax.f32 %v301_v12, 0.0 }
 0x254   : > { %v354_v42 = vmax.f32 %v352_v50, 0.0  ;;  %v355_v32 = vmax.f32 %v353_v24, 0.0 }
 0x255   : > { %v537_v43 = vpop.permute.xlu0 %536  ;;  %v539_v44 = vpop.permute.xlu1 %538 }
 0x256   : > { %v540_v38 = vmax.f32 %v533_v58, %v537_v43  ;;  %v541_v62 = vmax.f32 %v535_v35, %v539_v44  ;;  %v356_v58 = vmul.f32 %v354_v42, %v302_v56  ;;  %v357_v35 = vmul.f32 %v355_v32, %v303_v45 }
 0x258   : > { %v542_v36 = vmax.f32 %v540_v38, %v1801_v9  ;;  %v358_v27 = vsub.f32 %v354_v42, %v356_v58 }
 0x259   : > { %v585_v47 = vpop.permute.xlu0 %584  ;;  %v587_v55 = vpop.permute.xlu1 %586 }
 0x25a   : > { %v360_v16 = vmax.f32 %v358_v27, 0.0 }
 0x25c   : > { %v362_v5 = vadd.f32 %v360_v16, %v302_v56 }
 0x25d   : > { %v589_v6 = vpop.permute.xlu0 %588  ;;  %v591_v7 = vpop.permute.xlu1 %590 }
 0x25e   : > { %v592_v11 = vmax.f32 %v585_v47, %v589_v6  ;;  %v593_v48 = vmax.f32 %v587_v55, %v591_v7  ;;  %v543_v55 = vmax.f32 %v541_v62, %v1807_v10  ;;  %v359_v10 = vsub.f32 %v355_v32, %v357_v35 }
 0x260   : > { %v594_v63 = vmax.f32 %v592_v11, %v1822_v21  ;;  %v595_v33 = vmax.f32 %v593_v48, %v1825_v23  ;;  %v544_v21 = vsub.f32 %v1356_v3, %v542_v36  ;;  %v545_v7 = vsub.f32 %v1354_v2, %v543_v55 }
 0x261   : > { %v401_v34 = vpop.permute.xlu0 %400  ;;  %v403_v28 = vpop.permute.xlu1 %402 }
 0x262   : > { %v596_v43 = vsub.f32 %v1487_v14, %v594_v63  ;;  %v597_v44 = vsub.f32 %v1484_v13, %v595_v33  ;;  %v546_v22 = vmax.f32 %v544_v21, 0.0  ;;  %v547_v30 = vmax.f32 %v545_v7, 0.0 }
 0x265   : > { %v405_v37 = vpop.permute.xlu0 %404  ;;  %v407_v20 = vpop.permute.xlu1 %406 }
 0x266   : > { %v408_v57 = vmax.f32 %v401_v34, %v405_v37  ;;  %v409_v6 = vmax.f32 %v403_v28, %v407_v20  ;;  %v598_v34 = vmax.f32 %v596_v43, 0.0  ;;  %v599_v28 = vmax.f32 %v597_v44, 0.0 }
 0x267   : > { %v361_v37 = vmax.f32 %v359_v10, 0.0 }
 0x268   : > { %v410_v23 = vmax.f32 %v408_v57, %v1840_v26  ;;  %v411_v9 = vmax.f32 %v409_v6, %v1843_v18  ;;  %v600_v26 = vmul.f32 %v598_v34, %v546_v22  ;;  %v601_v50 = vmul.f32 %v599_v28, %v547_v30 }
 0x269   : > { %v645_v51 = vpop.permute.xlu0 %644  ;;  %v647_v47 = vpop.permute.xlu1 %646  ;;  %v363_v12 = vadd.f32 %v361_v37, %v303_v45 }
 0x26a   : > { %v412_v14 = vsub.f32 %v1542_v39, %v410_v23  ;;  %v413_v13 = vsub.f32 %v1549_v46, %v411_v9  ;;  %v602_v48 = vsub.f32 %v598_v34, %v600_v26  ;;  %v603_v38 = vsub.f32 %v599_v28, %v601_v50 }
 0x26c   : > { %v414_v11 = vmax.f32 %v412_v14, 0.0  ;;  %v415_v20 = vmax.f32 %v413_v13, 0.0  ;;  %v604_v32 = vmax.f32 %v602_v48, 0.0 }
 0x26d   : > { %v649_v15 = vpop.permute.xlu0 %648  ;;  %v651_v17 = vpop.permute.xlu1 %650 }
 0x26e   : > { %v652_v29 = vmax.f32 %v645_v51, %v649_v15  ;;  %v653_v31 = vmax.f32 %v647_v47, %v651_v17  ;;  %v416_v39 = vmul.f32 %v414_v11, %v362_v5  ;;  %v417_v42 = vmul.f32 %v415_v20, %v363_v12 }
 0x26f   : > { %v605_v51 = vmax.f32 %v603_v38, 0.0 }
 0x270   : > { %v654_v18 = vmax.f32 %v652_v29, %v1858_v40  ;;  %v655_v24 = vmax.f32 %v653_v31, %v1861_v52  ;;  %v418_v36 = vsub.f32 %v414_v11, %v416_v39  ;;  %v419_v40 = vsub.f32 %v415_v20, %v417_v42 }
 0x271   : > { %v606_v52 = vadd.f32 %v604_v32, %v546_v22  ;;  %v607_v58 = vadd.f32 %v605_v51, %v547_v30 }
 0x272   : > { %v656_v62 = vsub.f32 %v1574_v59, %v654_v18  ;;  %v657_v46 = vsub.f32 %v1577_v60, %v655_v24  ;;  %v420_v35 = vmax.f32 %v418_v36, 0.0  ;;  %v421_v23 = vmax.f32 %v419_v40, 0.0 }
 0x274   : > { %v658_v57 = vmax.f32 %v656_v62, 0.0  ;;  %v659_v47 = vmax.f32 %v657_v46, 0.0  ;;  %v422_v17 = vadd.f32 %v420_v35, %v362_v5  ;;  %v423_v14 = vadd.f32 %v421_v23, %v363_v12 }
 0x276   : > { %v660_v43 = vmul.f32 %v658_v57, %v606_v52  ;;  %v661_v44 = vmul.f32 %v659_v47, %v607_v58 }
 0x278   : > { %v662_v27 = vsub.f32 %v658_v57, %v660_v43  ;;  %v663_v10 = vsub.f32 %v659_v47, %v661_v44 }
 0x2b7   : > { %v461_v63 = vpop.permute.xlu0 %460 }
 0x2b8   : > { %v463_v33 = vpop.permute.xlu1 %462 }
 0x2bb   : > { %v465_v55 = vpop.permute.xlu0 %464 }
 0x2bc   : > { %v468_v6 = vmax.f32 %v461_v63, %v465_v55  ;;  %v467_v56 = vpop.permute.xlu1 %466 }
 0x2bd   : > { %v469_v45 = vmax.f32 %v463_v33, %v467_v56 }
 0x2be   : > { %v470_v59 = vmax.f32 %v468_v6, %v1923_v61 }
 0x2bf   : > { %v471_v60 = vmax.f32 %v469_v45, %v1925_v41  ;;  %v705_v21 = vpop.permute.xlu0 %704  ;;  %v664_v41 = vmax.f32 %v662_v27, 0.0 }
 0x2c0   : > { %v472_v7 = vsub.f32 %v1636_v49, %v470_v59  ;;  %v707_v9 = vpop.permute.xlu1 %706  ;;  %v665_v49 = vmax.f32 %v663_v10, 0.0 }
 0x2c1   : > { %v473_v15 = vsub.f32 %v1661_v4, %v471_v60  ;;  %v666_v24 = vadd.f32 %v664_v41, %v606_v52 }
 0x2c2   : > { %v474_v34 = vmax.f32 %v472_v7, 0.0  ;;  %v667_v38 = vadd.f32 %v665_v49, %v607_v58 }
 0x2c3   : > { %v475_v28 = vmax.f32 %v473_v15, 0.0  ;;  %v709_v22 = vpop.permute.xlu0 %708 }
 0x2c4   : > { %v712_v29 = vmax.f32 %v705_v21, %v709_v22  ;;  %v711_v61 = vpop.permute.xlu1 %710  ;;  %v476_v30 = vmul.f32 %v474_v34, %v422_v17 }
 0x2c5   : > { %v713_v13 = vmax.f32 %v707_v9, %v711_v61  ;;  %v477_v31 = vmul.f32 %v475_v28, %v423_v14 }
 0x2c6   : > { %v714_v16 = vmax.f32 %v712_v29, %v1947_v25  ;;  %v478_v26 = vsub.f32 %v474_v34, %v476_v30 }
 0x2c7   : > { %v715_v37 = vmax.f32 %v713_v13, %v1949_v19  ;;  %v479_v4 = vsub.f32 %v475_v28, %v477_v31 }
 0x2c8   : > { %v716_v50 = vsub.f32 %v1716_v53, %v714_v16  ;;  %v480_v11 = vmax.f32 %v478_v26, 0.0 }
 0x2c9   : > { %v717_v18 = vsub.f32 %v1719_v54, %v715_v37  ;;  %v481_v20 = vmax.f32 %v479_v4, 0.0 }
 0x2ca   : > { %v718_v48 = vmax.f32 %v716_v50, 0.0  ;;  %v482_v5 = vadd.f32 %v480_v11, %v422_v17 }
 0x2cb   : > { %v719_v12 = vmax.f32 %v717_v18, 0.0  ;;  %v483_v39 = vadd.f32 %v481_v20, %v423_v14 }
 0x2cc   : > { %v720_v62 = vmul.f32 %v718_v48, %v666_v24  ;;  %v728_v25 = vmul.f32 %v482_v5, %v1356_v3 }
 0x2cd   : > { %v721_v42 = vmul.f32 %v719_v12, %v667_v38  ;;  %v740_v46 = vadd.f32 %v483_v39, %v482_v5  ;;  %v729_v19 = vmul.f32 %v483_v39, %v1354_v2 }
 0x2ce   : > { %v722_v63 = vsub.f32 %v718_v48, %v720_v62 }
 0x2cf   : > { %v723_v32 = vsub.f32 %v719_v12, %v721_v42  ;;  %741 = vadd.xlane.f32.xlu1 %v740_v46  ;;  %v730_v53 = vadd.f32 %v729_v19, %v728_v25 }
 0x2d0   : > { %v724_v33 = vmax.f32 %v722_v63, 0.0 }
 0x2d1   : > { %731 = vadd.xlane.f32.xlu0 %v730_v53  ;;  %v725_v54 = vmax.f32 %v723_v32, 0.0 }
 0x2d2   : > { %v726_v51 = vadd.f32 %v724_v33, %v666_v24 }
 0x2d3   : > { %v727_v36 = vadd.f32 %v725_v54, %v667_v38 }
 0x2d4   : > { %v750_v57 = vmul.f32 %v726_v51, %v1342_v0 }
 0x2d5   : > { %v751_v40 = vmul.f32 %v727_v36, %v1348_v1  ;;  %v762_v3 = vadd.f32 %v727_v36, %v726_v51 }
 0x2d7   : > { %v752_v47 = vadd.f32 %v751_v40, %v750_v57 }
 0x2d9   : > { %753 = vadd.xlane.f32.xlu0 %v752_v47 }
 0x2dd   : > { %763 = vadd.xlane.f32.xlu0 %v762_v3 }
 0x358   : > { %v742_v55 = vpop.xlane.xlu1 %741 }
 0x359   : > { %v743_v52 = vrot.slane %v742_v55, 4 }
 0x35a   : > { %v732_v2 = vpop.xlane.xlu0 %731 }
 0x35b   : > { %v744_v6 = vadd.f32 %v743_v52, %v742_v55  ;;  %v733_v56 = vrot.slane %v732_v2, 4 }
 0x35d   : > { %v745_v58 = vrot.slane %v744_v6, 2  ;;  %v734_v45 = vadd.f32 %v733_v56, %v732_v2 }
 0x35f   : > { %v746_v43 = vadd.f32 %v745_v58, %v744_v6  ;;  %v735_v59 = vrot.slane %v734_v45, 2 }
 0x361   : > { %v736_v35 = vadd.f32 %v735_v59, %v734_v45  ;;  %v747_v60 = vrot.slane %v746_v43, 1 }
 0x362   : > { %v754_v44 = vpop.xlane.xlu0 %753 }
 0x363   : > { %v755_v21 = vrot.slane %v754_v44, 4  ;;  %v737_v0 = vrot.slane %v736_v35, 1  ;;  %v748_v9 = vadd.f32 %v747_v60, %v746_v43 }
 0x365   : > { %v756_v23 = vadd.f32 %v755_v21, %v754_v44  ;;  %v738_v1 = vadd.f32 %v737_v0, %v736_v35 }
 0x366   : > { %v764_v7 = vpop.xlane.xlu0 %763 }
 0x367   : > { %v757_v15 = vrot.slane %v756_v23, 2  ;;  %v765_v27 = vrot.slane %v764_v7, 4  ;;  %929 = vpush %v738_v1 }
 0x368   : > { %931 = vpush %v748_v9 }
 0x369   : > { %v766_v34 = vadd.f32 %v765_v27, %v764_v7  ;;  %v758_v17 = vadd.f32 %v757_v15, %v756_v23 }
 0x36b   : > { %v767_v10 = vrot.slane %v766_v34, 2  ;;  %v759_v28 = vrot.slane %v758_v17, 1 }
 0x36d   : > { %v768_v22 = vadd.f32 %v767_v10, %v766_v34  ;;  %v760_v14 = vadd.f32 %v759_v28, %v758_v17 }
 0x36f   : > { %933 = vpush %v760_v14  ;;  %v769_v29 = vrot.slane %v768_v22, 1 }
 0x371   : > { %v770_v61 = vadd.f32 %v769_v29, %v768_v22 }
 0x373   : > { %935 = vpush %v770_v61 }
 0x398   : > { %s930_s24 = spop %929 }
 0x399   : > { %s932_s5 = spop %931  ;;  %v772_v30 = vstv %s930_s24 }
 0x39a   : > { %v775_v13 = vstv %s932_s5  ;;  %v773_v31 = vsel %vm232_vm4, %v772_v30, 0.0 }
 0x39b   : > { %v776_v41 = vsel %vm774_vm6, %v775_v13, 0.0 }
 0x39c   : > { %v777_v49 = vadd.f32 %v776_v41, %v773_v31 }
 0x3a0   : > { %s934_s22 = spop %933 }
 0x3a1   : > { %v779_v16 = vstv %s934_s22 }
 0x3a2   : > { %v780_v26 = vsel %vm778_vm7, %v779_v16, 0.0 }
 0x3a3   : > { %v781_v37 = vadd.f32 %v780_v26, %v777_v49 }
 0x3a4   : > { %s936_s23 = spop %935 }
 0x3a5   : > { %v783_v4 = vstv %s936_s23 }
 0x3a6   : > { %v784_v50 = vsel %vm782_vm8, %v783_v4, 0.0 }
 0x3a7   : > { %v785_v11 = vadd.f32 %v784_v50, %v781_v37 }
 0x3a9   : > { %787 = vst.msk [vmem:[%s222_s6] sm:$0x1] %vm786_vm9, %v785_v11 }
 0x3aa   : > { %1094 = shalt.err (!%p1091_p3)
}
 0x3ab   : > { %s1095_s8 = scalar_lea.hbm %s801_s12, 16  ;;  %s1099_s24 = scalar_lea.hbm %s2049_s2, 96 }
 0x3ac   : > { %p1096_p5 = scmp.ne.s32.totalorder %s801_s12, %s1095_s8  ;;  %p1100_p10 = scmp.lt.s32.totalorder %s801_s12, %s2049_s2 }
 0x3ad   : > { %p1101_p11 = scmp.lt.s32.totalorder %s1099_s24, %s1095_s8 }
 0x3ae   : > { %p1097_p6 = pnand %p1096_p5, %p1270_p9 }
 0x3af   : > { %p1102_p8 = por %p1101_p11, %p1100_p10 }
 0x3b0   : > { %p1098_p7 = pneg %p1097_p6 }
 0x3b2   : > { %p1103_p0 = pnand %p1102_p8, %p1098_p7 }
 0x3b4   : > { %1106 = shalt.err (!%p1103_p0)
}
 0x3b5   : > { %942 = dma.vmem_to_hbm [thread:$0]  (%p1270_p9), %s804_s7, 16, %s801_s12, %s789_s18  }
 0x3b6 PF: > { %p956_p1 = scmp.ge.s32.totalorder %s1181_s16, 2  ;;  %s815_s22 = sand.u32 1, %s1153_s9  }
 0x3b7   : > { %s816_s26 = scalar_lea.sflag [#allocation4], %s815_s22 }
 0x3b8   : > { %p952_p13 = pnand %p956_p1, %p1276_p12 }
 0x3ba   : > { %p953_p2 = pneg %p952_p13 }
 0x3bc   : > { %1148 = dma.done.wait (%p953_p2), %s816_s26, 16  }
 0x3bd   : > { %1150 = vsyncadd (%p953_p2), %s816_s26, 4294967280  ;;  %s21_s16 = sadd.s32 1, %s1181_s16   ;;  %s2064_s25 = sld [smem:[#allocation11_spill]] }
 0x3be   : > { %p18_p4 = scmp.ge.s32.totalorder %s21_s16, 8   ;;  %s2065_s23 = sld [smem:[#allocation12_spill]] }
 0x3bf   : > { %s2066_s9 = smov %s1157_s10  ;;  %s2067_s10 = smov %s1161_s11 }
 0x3c0   : > { %s2068_s11 = smov %s1285_s30  ;;  %s2069_s12 = smov %s1173_s14 }
 0x3c1   : > { %s2070_s13 = smov %s1177_s15  ;;  %20 = sbr.rel (!%p18_p4) target bundleno = 11 (0xb), region = 86 }
 0x3c3   : > { %s2071_s14 = smov %s2064_s25 }
 0x3c4   : > { %s2072_s15 = smov %s2065_s23 }
 0x3c6   :  { %820 = vsyncpa [#allocation3], 1 }
 0x3c7   :  { %822 = vsyncpa [#allocation3 + $0x1], 1 }
 0x3c8   :  { %823 = vsyncpa [#allocation6], 1 }
 0x3c9   :  { %825 = vsyncpa [#allocation6 + $0x1], 1 }
 0x3ca   :  { %826 = vsyncpa [#allocation4], 1 }
 0x3cb   :  { %828 = vsyncpa [#allocation4 + $0x1], 1 }

</bundles_post_ra>
